<compile_context>
chip_gen: v7x
topology: tpu7x:2x2x1
jax: 0.10.0
libtpu: 0.0.40
codegen_flags: <defaults>
</compile_context>

<pallas_src>
import jax
import jax.numpy as jnp
from jax.experimental import pallas as pl
from jax.experimental.pallas import tpu as pltpu

_LANE = 128
_SUBLANE = 8
_MIB = 1024 * 1024


def _round_up(x, m):
    return (x + m - 1) // m * m


def _cdiv(a, b):
    return (a + b - 1) // b


def _vmem_capacity_bytes():
    """Physical VMEM per TensorCore; conservative 64-MiB fallback."""
    try:
        info = pltpu.get_tpu_info()
        cap = int(getattr(info, "vmem_capacity_bytes", 0) or 0)
        if cap > 0:
            return cap
    except Exception:
        pass
    return 64 * _MIB


def _make_mlp_kernel(num_layers: int):
    """Fused MLP: layer 0 K-tiled into an f32 accumulator; rest on last K step."""

    def kernel(x_ref, *refs):
        acc_ref = refs[-1]            # f32 [TILE_B, N1] scratch accumulator
        out_ref = refs[-2]
        params = refs[:-2]            # (w0, b0, w1, b1, ..., wL, bL)

        k = pl.program_id(1)

        @pl.when(k == 0)
        def _():
            acc_ref[...] = jnp.zeros_like(acc_ref)

        # Layer 0: partial matmul over this K tile (bf16 MXU, f32 accumulate).
        acc_ref[...] += jnp.dot(
            x_ref[...], params[0][...], preferred_element_type=jnp.float32
        )

        @pl.when(k == pl.num_programs(1) - 1)
        def _():
            h32 = acc_ref[...] + params[1][...]
            if num_layers == 1:
                out_ref[...] = h32.astype(out_ref.dtype)
            else:
                # dropout == identity (eval mode), then ReLU; bf16 for the MXU.
                h = jnp.maximum(h32, 0.0).astype(jnp.bfloat16)
                for li in range(1, num_layers):
                    w = params[2 * li][...]        # bf16 [K, N]
                    b = params[2 * li + 1][...]    # f32  [1, N]
                    acc = jnp.dot(h, w, preferred_element_type=jnp.float32) + b
                    if li < num_layers - 1:
                        h = jnp.maximum(acc, 0.0).astype(jnp.bfloat16)
                    else:
                        out_ref[...] = acc.astype(out_ref.dtype)

    return kernel


def mlp_forward(x, params, out_dtype=jnp.float32):
    """params: list of (W, b) with W: [out, in], b: [out] (PyTorch Linear)."""
    batch = x.shape[0]
    x_flat = x.reshape(batch, -1)                   # x.view(len(x), -1)
    n_inputs = x_flat.shape[1]
    n_outputs = params[-1][0].shape[0]
    num_layers = len(params)
    out_itemsize = jnp.dtype(out_dtype).itemsize

    # ---- padded feature dims (lane multiples) -------------------------------
    dims = [n_inputs] + [w.shape[0] for w, _ in params]
    feat_pad = [_round_up(d, _LANE) for d in dims]
    k0_128 = feat_pad[0]
    n1_pad = feat_pad[1]
    nout_pad = feat_pad[-1]
    max_feat = max(feat_pad[1:])

    # ---- hardware-derived VMEM budget ---------------------------------------
    vmem_cap = _vmem_capacity_bytes()
    # ~48 MiB on 64-MiB parts (v7x), ~96 MiB on 128-MiB parts (v5e/v6e).
    vmem_limit_cap = min(vmem_cap * 3 // 4, 100 * _MIB)
    budget = int(vmem_limit_cap * 0.85)             # headroom inside the limit
    two_tensorcores = vmem_cap <= 64 * _MIB         # v7x heuristic

    # Resident bytes: layer>=1 weights + all biases (single-buffered).
    resident = n1_pad * 4
    for li in range(1, num_layers):
        resident += feat_pad[li] * feat_pad[li + 1] * 2 + feat_pad[li + 1] * 4

    def tile_vmem_bytes(tb, tk_, ktiles):
        x_t = 2 * tb * tk_ * 2                       # bf16 x, double-buffered
        w0_t = (1 if ktiles == 1 else 2) * tk_ * n1_pad * 2
        out_t = 2 * tb * nout_pad * out_itemsize
        acc_t = tb * n1_pad * 4                      # f32 accumulator scratch
        act_t = 3 * tb * max_feat * 4                # compiler temporaries (est.)
        return resident + x_t + w0_t + out_t + acc_t + act_t

    # ---- batch tile: big on 128-MiB parts, >=2 tiles on 2-TC parts ----------
    b8 = _round_up(batch, _SUBLANE)
    max_tile_b = 512
    tile_b = b8 if b8 <= max_tile_b else max_tile_b
    if two_tensorcores and b8 >= 2 * _SUBLANE:
        tile_b = min(tile_b, _round_up(_cdiv(b8, 2), _SUBLANE))

    # ---- K tile for layer 0: tile K before starving the batch tile ----------
    tk = k0_128
    while True:
        ktiles = _cdiv(k0_128, tk)
        if tile_vmem_bytes(tile_b, tk, ktiles) <= budget:
            break
        if tk > 4 * _LANE:                           # keep K tiles >= 512
            tk = _round_up(tk // 2, _LANE)
        elif tile_b > _SUBLANE:
            tile_b = max(_SUBLANE, _round_up(tile_b // 2, _SUBLANE))
        else:
            break
    k_tiles = _cdiv(k0_128, tk)
    k0_pad = k_tiles * tk

    # ---- rebalance tile_b so batch padding wastes <8 rows -------------------
    tile_b = min(tile_b, b8)
    n_btiles = _cdiv(b8, tile_b)
    tile_b = _round_up(_cdiv(b8, n_btiles), _SUBLANE)
    b_pad = n_btiles * tile_b
    grid = (n_btiles, k_tiles)

    # ---- pad + cast operands (zero padding is a mathematical no-op) ---------
    x_p = jnp.pad(
        x_flat.astype(jnp.bfloat16),
        ((0, b_pad - batch), (0, k0_pad - n_inputs)),
    )

    flat_params = []
    for li, (w, b) in enumerate(params):
        k_p = k0_pad if li == 0 else feat_pad[li]
        n_p = feat_pad[li + 1]
        wt = jnp.pad(
            w.T.astype(jnp.bfloat16),
            ((0, k_p - w.shape[1]), (0, n_p - w.shape[0])),
        )
        bp = jnp.pad(
            b.astype(jnp.float32).reshape(1, -1),
            ((0, 0), (0, n_p - b.shape[0])),
        )
        flat_params += [wt, bp]

    def build_in_specs(single_buffer):
        def const_spec(shape):
            if single_buffer:
                # Block never changes across the grid: single-buffer it.
                return pl.BlockSpec(
                    shape, lambda i, k: (0, 0), pipeline_mode=pl.Buffered(1)
                )
            return pl.BlockSpec(shape, lambda i, k: (0, 0))

        specs = [pl.BlockSpec((tile_b, tk), lambda i, k: (i, k))]     # x
        if k_tiles == 1:
            specs.append(const_spec((tk, n1_pad)))                    # W0 resident
        else:
            specs.append(pl.BlockSpec((tk, n1_pad), lambda i, k: (k, 0)))
        specs.append(const_spec((1, n1_pad)))                         # b0
        for li in range(1, num_layers):
            specs.append(const_spec((feat_pad[li], feat_pad[li + 1])))
            specs.append(const_spec((1, feat_pad[li + 1])))
        return specs

    out_spec = pl.BlockSpec((tile_b, nout_pad), lambda i, k: (i, 0))

    vmem_needed = tile_vmem_bytes(tile_b, tk, k_tiles)
    vmem_limit = int(min(vmem_limit_cap, max(32 * _MIB, vmem_needed * 5 // 4)))

    flops = 2 * b_pad * (
        k0_pad * n1_pad
        + sum(feat_pad[i] * feat_pad[i + 1] for i in range(1, num_layers))
    )
    param_bytes = sum(int(p.size) * p.dtype.itemsize for p in flat_params)
    bytes_accessed = int(
        x_p.size * 2 + param_bytes + b_pad * nout_pad * out_itemsize
    )

    def run(single_buffer):
        return pl.pallas_call(
            _make_mlp_kernel(num_layers),
            out_shape=jax.ShapeDtypeStruct((b_pad, nout_pad), out_dtype),
            grid=grid,
            in_specs=build_in_specs(single_buffer),
            out_specs=out_spec,
            scratch_shapes=[pltpu.VMEM((tile_b, n1_pad), jnp.float32)],
            compiler_params=pltpu.CompilerParams(
                dimension_semantics=("parallel", "arbitrary"),
                vmem_limit_bytes=vmem_limit,
            ),
            cost_estimate=pl.CostEstimate(
                flops=flops, transcendentals=0, bytes_accessed=bytes_accessed
            ),
        )(x_p, *flat_params)

    try:
        out = run(single_buffer=True)
    except Exception:
        # Fallback for JAX versions without BlockSpec(pipeline_mode=pl.Buffered(1)):
        # default double-buffering (same results, slightly more VMEM).
        out = run(single_buffer=False)

    return out[:batch, :n_outputs]


def init_mlp_params(key, n_inputs, n_outputs, mlp_width, mlp_depth):
    """Deterministic PyTorch-default-style init: U(-1/sqrt(fan_in), 1/sqrt(fan_in))."""
    dims = [n_inputs] + [mlp_width] * (mlp_depth - 1) + [n_outputs]
    params = []
    for i in range(len(dims) - 1):
        fan_in, fan_out = dims[i], dims[i + 1]
        key, kw, kb = jax.random.split(key, 3)
        bound = 1.0 / jnp.sqrt(jnp.float32(fan_in))
        w = jax.random.uniform(kw, (fan_out, fan_in), jnp.float32, -bound, bound)
        b = jax.random.uniform(kb, (fan_out,), jnp.float32, -bound, bound)
        params.append((w, b))
    return params


def mlp_reference(x, params, compute_dtype=jnp.float32):
    """Plain-JAX reference. compute_dtype=bf16 mirrors the kernel's MXU inputs."""
    h = x.reshape(x.shape[0], -1).astype(compute_dtype).astype(jnp.float32)
    for i, (w, b) in enumerate(params):
        w32 = w.astype(compute_dtype).astype(jnp.float32)
        h = h @ w32.T + b.astype(jnp.float32)
        if i < len(params) - 1:
            h = jnp.maximum(h, 0.0)
    return h


if __name__ == "__main__":
    key = jax.random.PRNGKey(0)

    # Small shapes consistent with the module: NCHW input flattened to C*H*W.
    B, C, H, W = 2, 4, 16, 16
    n_inputs = C * H * W
    hparams = {"mlp_width": 32, "mlp_depth": 3, "mlp_dropout": 0.0}
    n_outputs = 8

    key, kx = jax.random.split(key)
    x = jax.random.normal(kx, (B, C, H, W), jnp.float32)

    params = init_mlp_params(
        key, n_inputs, n_outputs, hparams["mlp_width"], hparams["mlp_depth"]
    )

    out = mlp_forward(x, params)
    out = jax.block_until_ready(out)
    assert out.shape == (B, n_outputs), out.shape

    # Tight check vs a bf16-input / f32-accumulation reference (same numerics).
    ref_bf16 = mlp_reference(x, params, compute_dtype=jnp.bfloat16)
    assert jnp.allclose(out, ref_bf16, atol=1e-2, rtol=1e-2), "mismatch vs bf16 ref"

    # Looser sanity check vs the full-f32 PyTorch-equivalent reference.
    ref_f32 = mlp_reference(x, params, compute_dtype=jnp.float32)
    assert jnp.allclose(out, ref_f32, atol=5e-2, rtol=5e-2), "mismatch vs f32 ref"

    print("KERNEL_OK")
</pallas_src>

<mosaic_0001>
module attributes {stable_mosaic.version = 11 : i64} {
  func.func @kernel(%arg0: i32, %arg1: i32, %arg2: memref<8x1024xbf16, #tpu.memory_space<vmem>>, %arg3: memref<1024x128xbf16, #tpu.memory_space<vmem>>, %arg4: memref<1x128xf32, #tpu.memory_space<vmem>>, %arg5: memref<128x128xbf16, #tpu.memory_space<vmem>>, %arg6: memref<1x128xf32, #tpu.memory_space<vmem>>, %arg7: memref<128x128xbf16, #tpu.memory_space<vmem>>, %arg8: memref<1x128xf32, #tpu.memory_space<vmem>>, %arg9: memref<8x128xf32, #tpu.memory_space<vmem>>, %arg10: memref<8x128xf32, #tpu.memory_space<vmem>>) attributes {dimension_semantics = [#tpu.dimension_semantics<parallel>, #tpu.dimension_semantics<arbitrary>], iteration_bounds = array<i64: 1, 1>, scalar_prefetch = 0 : i64, scratch_operands = 1 : i64, tpu.core_type = #tpu.core_type<tc>, window_params = [{transform_indices = @transform_0, window_bounds = array<i64: 8, 1024>}, {pipeline_mode = #tpu.pipeline_mode<synchronous>, transform_indices = @transform_1, window_bounds = array<i64: 1024, 128>}, {pipeline_mode = #tpu.pipeline_mode<synchronous>, transform_indices = @transform_2, window_bounds = array<i64: 1, 128>}, {pipeline_mode = #tpu.pipeline_mode<synchronous>, transform_indices = @transform_3, window_bounds = array<i64: 128, 128>}, {pipeline_mode = #tpu.pipeline_mode<synchronous>, transform_indices = @transform_4, window_bounds = array<i64: 1, 128>}, {pipeline_mode = #tpu.pipeline_mode<synchronous>, transform_indices = @transform_5, window_bounds = array<i64: 128, 128>}, {pipeline_mode = #tpu.pipeline_mode<synchronous>, transform_indices = @transform_6, window_bounds = array<i64: 1, 128>}, {transform_indices = @transform_7, window_bounds = array<i64: 8, 128>}]} {
    %c0_i32 = arith.constant 0 : i32
    %0 = arith.cmpi eq, %arg1, %c0_i32 : i32
    %1 = arith.extui %0 : i1 to i32
    %c0_i32_0 = arith.constant 0 : i32
    %2 = arith.cmpi ne, %1, %c0_i32_0 : i32
    scf.if %2 {
      %cst_10 = arith.constant 0.000000e+00 : f32
      %12 = vector.broadcast %cst_10 : f32 to vector<8x128xf32>
      %c0_11 = arith.constant 0 : index
      %c0_12 = arith.constant 0 : index
      %13 = vector.load %arg10[%c0_11, %c0_12] : memref<8x128xf32, #tpu.memory_space<vmem>>, vector<8x128xf32>
      tpu.vector_store %arg10[%c0_11, %c0_12], %12 {strides = array<i32>} : memref<8x128xf32, #tpu.memory_space<vmem>>, vector<8x128xf32>,
    } else {
    }
    %c0 = arith.constant 0 : index
    %c0_1 = arith.constant 0 : index
    %3 = vector.load %arg10[%c0, %c0_1] : memref<8x128xf32, #tpu.memory_space<vmem>>, vector<8x128xf32>
    %c0_2 = arith.constant 0 : index
    %c0_3 = arith.constant 0 : index
    %4 = vector.load %arg2[%c0_2, %c0_3] : memref<8x1024xbf16, #tpu.memory_space<vmem>>, vector<8x1024xbf16>
    %c0_4 = arith.constant 0 : index
    %c0_5 = arith.constant 0 : index
    %5 = vector.load %arg3[%c0_4, %c0_5] : memref<1024x128xbf16, #tpu.memory_space<vmem>>, vector<1024x128xbf16>
    %cst = arith.constant dense<0.000000e+00> : vector<8x128xf32>
    %6 = tpu.matmul %4, %5, %cst {dimension_numbers = #tpu.dot_dimension_numbers<[1], [0], [0], [1], [0, 0, 1, 1], [], []>} : vector<8x1024xbf16>, vector<1024x128xbf16>, vector<8x128xf32> -> vector<8x128xf32>
    %7 = arith.addf %3, %6 : vector<8x128xf32>
    %c0_6 = arith.constant 0 : index
    %c0_7 = arith.constant 0 : index
    %8 = vector.load %arg10[%c0_6, %c0_7] : memref<8x128xf32, #tpu.memory_space<vmem>>, vector<8x128xf32>
    tpu.vector_store %arg10[%c0_6, %c0_7], %7 {strides = array<i32>} : memref<8x128xf32, #tpu.memory_space<vmem>>, vector<8x128xf32>,
    %c0_i32_8 = arith.constant 0 : i32
    %9 = arith.cmpi eq, %arg1, %c0_i32_8 : i32
    %10 = arith.extui %9 : i1 to i32
    %c0_i32_9 = arith.constant 0 : i32
    %11 = arith.cmpi ne, %10, %c0_i32_9 : i32
    scf.if %11 {
      %c0_10 = arith.constant 0 : index
      %c0_11 = arith.constant 0 : index
      %12 = vector.load %arg10[%c0_10, %c0_11] : memref<8x128xf32, #tpu.memory_space<vmem>>, vector<8x128xf32>
      %c0_12 = arith.constant 0 : index
      %c0_13 = arith.constant 0 : index
      %13 = vector.load %arg4[%c0_12, %c0_13] : memref<1x128xf32, #tpu.memory_space<vmem>>, vector<1x128xf32>
      %14 = vector.broadcast %13 : vector<1x128xf32> to vector<8x128xf32>
      %15 = arith.addf %12, %14 : vector<8x128xf32>
      %cst_14 = arith.constant 0.000000e+00 : f32
      %16 = vector.broadcast %cst_14 : f32 to vector<8x128xf32>
      %17 = arith.maximumf %15, %16 : vector<8x128xf32>
      %18 = arith.truncf %17 : vector<8x128xf32> to vector<8x128xbf16>
      %c0_15 = arith.constant 0 : index
      %c0_16 = arith.constant 0 : index
      %19 = vector.load %arg5[%c0_15, %c0_16] : memref<128x128xbf16, #tpu.memory_space<vmem>>, vector<128x128xbf16>
      %c0_17 = arith.constant 0 : index
      %c0_18 = arith.constant 0 : index
      %20 = vector.load %arg6[%c0_17, %c0_18] : memref<1x128xf32, #tpu.memory_space<vmem>>, vector<1x128xf32>
      %cst_19 = arith.constant dense<0.000000e+00> : vector<8x128xf32>
      %21 = tpu.matmul %18, %19, %cst_19 {dimension_numbers = #tpu.dot_dimension_numbers<[1], [0], [0], [1], [0, 0, 1, 1], [], []>} : vector<8x128xbf16>, vector<128x128xbf16>, vector<8x128xf32> -> vector<8x128xf32>
      %22 = vector.broadcast %20 : vector<1x128xf32> to vector<8x128xf32>
      %23 = arith.addf %21, %22 : vector<8x128xf32>
      %cst_20 = arith.constant 0.000000e+00 : f32
      %24 = vector.broadcast %cst_20 : f32 to vector<8x128xf32>
      %25 = arith.maximumf %23, %24 : vector<8x128xf32>
      %26 = arith.truncf %25 : vector<8x128xf32> to vector<8x128xbf16>
      %c0_21 = arith.constant 0 : index
      %c0_22 = arith.constant 0 : index
      %27 = vector.load %arg7[%c0_21, %c0_22] : memref<128x128xbf16, #tpu.memory_space<vmem>>, vector<128x128xbf16>
      %c0_23 = arith.constant 0 : index
      %c0_24 = arith.constant 0 : index
      %28 = vector.load %arg8[%c0_23, %c0_24] : memref<1x128xf32, #tpu.memory_space<vmem>>, vector<1x128xf32>
      %cst_25 = arith.constant dense<0.000000e+00> : vector<8x128xf32>
      %29 = tpu.matmul %26, %27, %cst_25 {dimension_numbers = #tpu.dot_dimension_numbers<[1], [0], [0], [1], [0, 0, 1, 1], [], []>} : vector<8x128xbf16>, vector<128x128xbf16>, vector<8x128xf32> -> vector<8x128xf32>
      %30 = vector.broadcast %28 : vector<1x128xf32> to vector<8x128xf32>
      %31 = arith.addf %29, %30 : vector<8x128xf32>
      %c0_26 = arith.constant 0 : index
      %c0_27 = arith.constant 0 : index
      %32 = vector.load %arg9[%c0_26, %c0_27] : memref<8x128xf32, #tpu.memory_space<vmem>>, vector<8x128xf32>
      tpu.vector_store %arg9[%c0_26, %c0_27], %31 {strides = array<i32>} : memref<8x128xf32, #tpu.memory_space<vmem>>, vector<8x128xf32>,
    } else {
    }
    return
  }
  func.func @transform_0(%arg0: i32, %arg1: i32) -> (i32, i32) {
    %c0_i32 = arith.constant 0 : i32
    return %arg0, %arg1 : i32, i32
  }
  func.func @transform_1(%arg0: i32, %arg1: i32) -> (i32, i32) {
    %c0_i32 = arith.constant 0 : i32
    %c0_i32_0 = arith.constant 0 : i32
    %c0_i32_1 = arith.constant 0 : i32
    return %c0_i32, %c0_i32_0 : i32, i32
  }
  func.func @transform_2(%arg0: i32, %arg1: i32) -> (i32, i32) {
    %c0_i32 = arith.constant 0 : i32
    %c0_i32_0 = arith.constant 0 : i32
    %c0_i32_1 = arith.constant 0 : i32
    return %c0_i32, %c0_i32_0 : i32, i32
  }
  func.func @transform_3(%arg0: i32, %arg1: i32) -> (i32, i32) {
    %c0_i32 = arith.constant 0 : i32
    %c0_i32_0 = arith.constant 0 : i32
    %c0_i32_1 = arith.constant 0 : i32
    return %c0_i32, %c0_i32_0 : i32, i32
  }
  func.func @transform_4(%arg0: i32, %arg1: i32) -> (i32, i32) {
    %c0_i32 = arith.constant 0 : i32
    %c0_i32_0 = arith.constant 0 : i32
    %c0_i32_1 = arith.constant 0 : i32
    return %c0_i32, %c0_i32_0 : i32, i32
  }
  func.func @transform_5(%arg0: i32, %arg1: i32) -> (i32, i32) {
    %c0_i32 = arith.constant 0 : i32
    %c0_i32_0 = arith.constant 0 : i32
    %c0_i32_1 = arith.constant 0 : i32
    return %c0_i32, %c0_i32_0 : i32, i32
  }
  func.func @transform_6(%arg0: i32, %arg1: i32) -> (i32, i32) {
    %c0_i32 = arith.constant 0 : i32
    %c0_i32_0 = arith.constant 0 : i32
    %c0_i32_1 = arith.constant 0 : i32
    return %c0_i32, %c0_i32_0 : i32, i32
  }
  func.func @transform_7(%arg0: i32, %arg1: i32) -> (i32, i32) {
    %c0_i32 = arith.constant 0 : i32
    %c0_i32_0 = arith.constant 0 : i32
    return %arg0, %c0_i32 : i32, i32
  }
}

module attributes {stable_mosaic.version = 11 : i64} {
  func.func @kernel(%arg0: i32, %arg1: i32, %arg2: memref<8x1024xbf16, #tpu.memory_space<vmem>>, %arg3: memref<1024x128xbf16, #tpu.memory_space<vmem>>, %arg4: memref<1x128xf32, #tpu.memory_space<vmem>>, %arg5: memref<128x128xbf16, #tpu.memory_space<vmem>>, %arg6: memref<1x128xf32, #tpu.memory_space<vmem>>, %arg7: memref<128x128xbf16, #tpu.memory_space<vmem>>, %arg8: memref<1x128xf32, #tpu.memory_space<vmem>>, %arg9: memref<8x128xf32, #tpu.memory_space<vmem>>, %arg10: memref<8x128xf32, #tpu.memory_space<vmem>>) attributes {dimension_semantics = [#tpu.dimension_semantics<parallel>, #tpu.dimension_semantics<arbitrary>], iteration_bounds = array<i64: 1, 1>, scalar_prefetch = 0 : i64, scratch_operands = 1 : i64, tpu.core_type = #tpu.core_type<tc>, window_params = [{transform_indices = @transform_0, window_bounds = array<i64: 8, 1024>}, {pipeline_mode = #tpu.pipeline_mode<synchronous>, transform_indices = @transform_1, window_bounds = array<i64: 1024, 128>}, {pipeline_mode = #tpu.pipeline_mode<synchronous>, transform_indices = @transform_2, window_bounds = array<i64: 1, 128>}, {pipeline_mode = #tpu.pipeline_mode<synchronous>, transform_indices = @transform_3, window_bounds = array<i64: 128, 128>}, {pipeline_mode = #tpu.pipeline_mode<synchronous>, transform_indices = @transform_4, window_bounds = array<i64: 1, 128>}, {pipeline_mode = #tpu.pipeline_mode<synchronous>, transform_indices = @transform_5, window_bounds = array<i64: 128, 128>}, {pipeline_mode = #tpu.pipeline_mode<synchronous>, transform_indices = @transform_6, window_bounds = array<i64: 1, 128>}, {transform_indices = @transform_7, window_bounds = array<i64: 8, 128>}]} {
    %c0_i32 = arith.constant 0 : i32
    %0 = arith.cmpi eq, %arg1, %c0_i32 : i32
    %1 = arith.extui %0 : i1 to i32
    %c0_i32_0 = arith.constant 0 : i32
    %2 = arith.cmpi ne, %1, %c0_i32_0 : i32
    scf.if %2 {
      %cst_10 = arith.constant 0.000000e+00 : f32
      %12 = vector.broadcast %cst_10 : f32 to vector<8x128xf32>
      %c0_11 = arith.constant 0 : index
      %c0_12 = arith.constant 0 : index
      %13 = vector.load %arg10[%c0_11, %c0_12] : memref<8x128xf32, #tpu.memory_space<vmem>>, vector<8x128xf32>
      tpu.vector_store %arg10[%c0_11, %c0_12], %12 {strides = array<i32>} : memref<8x128xf32, #tpu.memory_space<vmem>>, vector<8x128xf32>,
    } else {
    }
    %c0 = arith.constant 0 : index
    %c0_1 = arith.constant 0 : index
    %3 = vector.load %arg10[%c0, %c0_1] : memref<8x128xf32, #tpu.memory_space<vmem>>, vector<8x128xf32>
    %c0_2 = arith.constant 0 : index
    %c0_3 = arith.constant 0 : index
    %4 = vector.load %arg2[%c0_2, %c0_3] : memref<8x1024xbf16, #tpu.memory_space<vmem>>, vector<8x1024xbf16>
    %c0_4 = arith.constant 0 : index
    %c0_5 = arith.constant 0 : index
    %5 = vector.load %arg3[%c0_4, %c0_5] : memref<1024x128xbf16, #tpu.memory_space<vmem>>, vector<1024x128xbf16>
    %cst = arith.constant dense<0.000000e+00> : vector<8x128xf32>
    %6 = tpu.matmul %4, %5, %cst {dimension_numbers = #tpu.dot_dimension_numbers<[1], [0], [0], [1], [0, 0, 1, 1], [], []>} : vector<8x1024xbf16>, vector<1024x128xbf16>, vector<8x128xf32> -> vector<8x128xf32>
    %7 = arith.addf %3, %6 : vector<8x128xf32>
    %c0_6 = arith.constant 0 : index
    %c0_7 = arith.constant 0 : index
    %8 = vector.load %arg10[%c0_6, %c0_7] : memref<8x128xf32, #tpu.memory_space<vmem>>, vector<8x128xf32>
    tpu.vector_store %arg10[%c0_6, %c0_7], %7 {strides = array<i32>} : memref<8x128xf32, #tpu.memory_space<vmem>>, vector<8x128xf32>,
    %c0_i32_8 = arith.constant 0 : i32
    %9 = arith.cmpi eq, %arg1, %c0_i32_8 : i32
    %10 = arith.extui %9 : i1 to i32
    %c0_i32_9 = arith.constant 0 : i32
    %11 = arith.cmpi ne, %10, %c0_i32_9 : i32
    scf.if %11 {
      %c0_10 = arith.constant 0 : index
      %c0_11 = arith.constant 0 : index
      %12 = vector.load %arg10[%c0_10, %c0_11] : memref<8x128xf32, #tpu.memory_space<vmem>>, vector<8x128xf32>
      %c0_12 = arith.constant 0 : index
      %c0_13 = arith.constant 0 : index
      %13 = vector.load %arg4[%c0_12, %c0_13] : memref<1x128xf32, #tpu.memory_space<vmem>>, vector<1x128xf32>
      %14 = vector.broadcast %13 : vector<1x128xf32> to vector<8x128xf32>
      %15 = arith.addf %12, %14 : vector<8x128xf32>
      %cst_14 = arith.constant 0.000000e+00 : f32
      %16 = vector.broadcast %cst_14 : f32 to vector<8x128xf32>
      %17 = arith.maximumf %15, %16 : vector<8x128xf32>
      %18 = arith.truncf %17 : vector<8x128xf32> to vector<8x128xbf16>
      %c0_15 = arith.constant 0 : index
      %c0_16 = arith.constant 0 : index
      %19 = vector.load %arg5[%c0_15, %c0_16] : memref<128x128xbf16, #tpu.memory_space<vmem>>, vector<128x128xbf16>
      %c0_17 = arith.constant 0 : index
      %c0_18 = arith.constant 0 : index
      %20 = vector.load %arg6[%c0_17, %c0_18] : memref<1x128xf32, #tpu.memory_space<vmem>>, vector<1x128xf32>
      %cst_19 = arith.constant dense<0.000000e+00> : vector<8x128xf32>
      %21 = tpu.matmul %18, %19, %cst_19 {dimension_numbers = #tpu.dot_dimension_numbers<[1], [0], [0], [1], [0, 0, 1, 1], [], []>} : vector<8x128xbf16>, vector<128x128xbf16>, vector<8x128xf32> -> vector<8x128xf32>
      %22 = vector.broadcast %20 : vector<1x128xf32> to vector<8x128xf32>
      %23 = arith.addf %21, %22 : vector<8x128xf32>
      %cst_20 = arith.constant 0.000000e+00 : f32
      %24 = vector.broadcast %cst_20 : f32 to vector<8x128xf32>
      %25 = arith.maximumf %23, %24 : vector<8x128xf32>
      %26 = arith.truncf %25 : vector<8x128xf32> to vector<8x128xbf16>
      %c0_21 = arith.constant 0 : index
      %c0_22 = arith.constant 0 : index
      %27 = vector.load %arg7[%c0_21, %c0_22] : memref<128x128xbf16, #tpu.memory_space<vmem>>, vector<128x128xbf16>
      %c0_23 = arith.constant 0 : index
      %c0_24 = arith.constant 0 : index
      %28 = vector.load %arg8[%c0_23, %c0_24] : memref<1x128xf32, #tpu.memory_space<vmem>>, vector<1x128xf32>
      %cst_25 = arith.constant dense<0.000000e+00> : vector<8x128xf32>
      %29 = tpu.matmul %26, %27, %cst_25 {dimension_numbers = #tpu.dot_dimension_numbers<[1], [0], [0], [1], [0, 0, 1, 1], [], []>} : vector<8x128xbf16>, vector<128x128xbf16>, vector<8x128xf32> -> vector<8x128xf32>
      %30 = vector.broadcast %28 : vector<1x128xf32> to vector<8x128xf32>
      %31 = arith.addf %29, %30 : vector<8x128xf32>
      %c0_26 = arith.constant 0 : index
      %c0_27 = arith.constant 0 : index
      %32 = vector.load %arg9[%c0_26, %c0_27] : memref<8x128xf32, #tpu.memory_space<vmem>>, vector<8x128xf32>
      tpu.vector_store %arg9[%c0_26, %c0_27], %31 {strides = array<i32>} : memref<8x128xf32, #tpu.memory_space<vmem>>, vector<8x128xf32>,
    } else {
    }
    return
  }
  func.func @transform_0(%arg0: i32, %arg1: i32) -> (i32, i32) {
    %c0_i32 = arith.constant 0 : i32
    return %arg0, %arg1 : i32, i32
  }
  func.func @transform_1(%arg0: i32, %arg1: i32) -> (i32, i32) {
    %c0_i32 = arith.constant 0 : i32
    %c0_i32_0 = arith.constant 0 : i32
    %c0_i32_1 = arith.constant 0 : i32
    return %c0_i32, %c0_i32_0 : i32, i32
  }
  func.func @transform_2(%arg0: i32, %arg1: i32) -> (i32, i32) {
    %c0_i32 = arith.constant 0 : i32
    %c0_i32_0 = arith.constant 0 : i32
    %c0_i32_1 = arith.constant 0 : i32
    return %c0_i32, %c0_i32_0 : i32, i32
  }
  func.func @transform_3(%arg0: i32, %arg1: i32) -> (i32, i32) {
    %c0_i32 = arith.constant 0 : i32
    %c0_i32_0 = arith.constant 0 : i32
    %c0_i32_1 = arith.constant 0 : i32
    return %c0_i32, %c0_i32_0 : i32, i32
  }
  func.func @transform_4(%arg0: i32, %arg1: i32) -> (i32, i32) {
    %c0_i32 = arith.constant 0 : i32
    %c0_i32_0 = arith.constant 0 : i32
    %c0_i32_1 = arith.constant 0 : i32
    return %c0_i32, %c0_i32_0 : i32, i32
  }
  func.func @transform_5(%arg0: i32, %arg1: i32) -> (i32, i32) {
    %c0_i32 = arith.constant 0 : i32
    %c0_i32_0 = arith.constant 0 : i32
    %c0_i32_1 = arith.constant 0 : i32
    return %c0_i32, %c0_i32_0 : i32, i32
  }
  func.func @transform_6(%arg0: i32, %arg1: i32) -> (i32, i32) {
    %c0_i32 = arith.constant 0 : i32
    %c0_i32_0 = arith.constant 0 : i32
    %c0_i32_1 = arith.constant 0 : i32
    return %c0_i32, %c0_i32_0 : i32, i32
  }
  func.func @transform_7(%arg0: i32, %arg1: i32) -> (i32, i32) {
    %c0_i32 = arith.constant 0 : i32
    %c0_i32_0 = arith.constant 0 : i32
    return %arg0, %c0_i32 : i32, i32
  }
}

</mosaic_0001>

<bundles_post_ra>
// kernel: tpu_custom_call.1
= control target key start
LH: loop header
LB: loop body
LE: loop exit
PB: predicated region body
PF: predicated region fallthrough
CT: control target
= control target key end

     0   :  { %12 = vsyncpa [#allocation4], 0  ;;  %s1646_s0 = inlined_call_operand.hbm [shape: bf16[8,1024], index: 0, kind: input, shape index: {}]   ;;  %s1647_s1 = inlined_call_operand.hbm [shape: bf16[1024,128], index: 1, kind: input, shape index: {}]   ;;  %s1648_s2 = inlined_call_operand.vmem [shape: f32[1,128], index: 2, kind: input, shape index: {}]   ;;  %s1649_s3 = inlined_call_operand.hbm [shape: bf16[128,128], index: 3, kind: input, shape index: {}]   ;;  %s1650_s4 = inlined_call_operand.vmem [shape: f32[1,128], index: 4, kind: input, shape index: {}]   ;;  %s1651_s5 = inlined_call_operand.hbm [shape: bf16[128,128], index: 5, kind: input, shape index: {}]   ;;  %s1652_s6 = inlined_call_operand.vmem [shape: f32[1,128], index: 6, kind: input, shape index: {}]   ;;  %s1653_s7 = inlined_call_operand.hbm [shape: f32[8,128], index: 7, kind: output, shape index: {}]  }
   0x1   :  { %13 = vsyncpa [#allocation7], 0 }
   0x2   :  { %14 = vsyncpa [#allocation10], 0 }
   0x3   :  { %15 = vsyncpa [#allocation5], 0  ;;  %s1501_s24 = smov [#allocation6]   ;;  %s1383_s28 = scalar_lea.hbm %s1647_s1, 8192 }
   0x4   :  { %s31_s25 = sshll.u32 %s1501_s24, 4  ;;  %p1384_p0 = scmp.ne.s32.totalorder %s1647_s1, %s1383_s28  ;;  %s32_s25 = int_to_ptr.vmem [resolvable:$true] %s31_s25 }
   0x5   :  { %p1387_p1 = scmp.lt.u32.totalorder %s1383_s28, %s1647_s1 }
   0x7   :  { %p1389_p2 = pnand %p1387_p1, %p1384_p0 }
   0x9   :  { %1392 = shalt.err (!%p1389_p2)
}
   0xa   :  { %s1393_s10 = scalar_lea.vmem %s32_s25, 8192  ;;  %p1398_p4 = scmp.lt.s32.totalorder %s32_s25, %s32_s25 }
   0xb   :  { %p1394_p3 = scmp.ne.s32.totalorder %s32_s25, %s1393_s10  ;;  %p1399_p5 = scmp.lt.s32.totalorder %s1393_s10, %s1393_s10 }
   0xd   :  { %p1400_p6 = por %p1399_p5, %p1398_p4 }
   0xf   :  { %p1401_p7 = pnand %p1400_p6, %p1394_p3 }
  0x11   :  { %1404 = shalt.err (!%p1401_p7)
}
  0x12   :  { %s1502_s11 = smov 64   ;;  %s1503_s12 = smov 4  }
  0x13   :  { %37 = dma.hbm_to_vmem [thread:$0]  %s1647_s1, 8192, %s32_s25, [#allocation7], %s1502_s11, %s1502_s11, %s1503_s12  }
  0x14   :  { %s1504_s15 = smov [#allocation3]   ;;  %s1505_s17 = smov [#allocation8]  }
  0x15   :  { %s22_s16 = sshll.u32 %s1504_s15, 4  ;;  %s45_s18 = sshll.u32 %s1505_s17, 4  ;;  %s23_s16 = int_to_ptr.vmem [resolvable:$true] %s22_s16  ;;  %s46_s18 = int_to_ptr.vmem [resolvable:$true] %s45_s18 }
  0x16   :  { %s1405_s21 = scalar_lea.hbm %s1646_s0, 512 }
  0x17   :  { %p1406_p8 = scmp.ne.s32.totalorder %s1646_s0, %s1405_s21  ;;  %p1409_p9 = scmp.lt.u32.totalorder %s1405_s21, %s1646_s0 }
  0x19   :  { %p1411_p10 = pnand %p1409_p9, %p1406_p8 }
  0x1b   :  { %1414 = shalt.err (!%p1411_p10)
}
  0x1c   :  { %s1415_s1 = scalar_lea.vmem %s23_s16, 512  ;;  %p1420_p12 = scmp.lt.s32.totalorder %s23_s16, %s23_s16 }
  0x1d   :  { %p1416_p11 = scmp.ne.s32.totalorder %s23_s16, %s1415_s1  ;;  %p1421_p13 = scmp.lt.s32.totalorder %s1415_s1, %s1415_s1 }
  0x1f   :  { %p1422_p0 = por %p1421_p13, %p1420_p12 }
  0x21   :  { %p1423_p1 = pnand %p1422_p0, %p1416_p11 }
  0x23   :  { %1426 = shalt.err (!%p1423_p1)
}
  0x24   :  { %25 = dma.hbm_to_vmem [thread:$0]  %s1646_s0, 512, %s23_s16, [#allocation4]  }
  0x25   :  { %s1427_s30 = scalar_lea.hbm %s1649_s3, 1024 }
  0x26   :  { %p1428_p2 = scmp.ne.s32.totalorder %s1649_s3, %s1427_s30  ;;  %p1431_p3 = scmp.lt.u32.totalorder %s1427_s30, %s1649_s3 }
  0x28   :  { %p1433_p4 = pnand %p1431_p3, %p1428_p2 }
  0x2a   :  { %1436 = shalt.err (!%p1433_p4)
}
  0x2b   :  { %s1437_s14 = scalar_lea.vmem %s46_s18, 1024  ;;  %p1442_p6 = scmp.lt.s32.totalorder %s46_s18, %s46_s18 }
  0x2c   :  { %p1438_p5 = scmp.ne.s32.totalorder %s46_s18, %s1437_s14  ;;  %p1443_p7 = scmp.lt.s32.totalorder %s1437_s14, %s1437_s14 }
  0x2e   :  { %p1444_p8 = por %p1443_p7, %p1442_p6 }
  0x30   :  { %p1445_p9 = pnand %p1444_p8, %p1438_p5 }
  0x32   :  { %1448 = shalt.err (!%p1445_p9)
}
  0x33   :  { %51 = dma.hbm_to_vmem [thread:$0]  %s1649_s3, 1024, %s46_s18, [#allocation7], %s1502_s11, %s1502_s11, %s1503_s12  }
  0x34   :  { %s1506_s16 = smov [#allocation9]   ;;  %s1449_s21 = scalar_lea.hbm %s1651_s5, 1024 }
  0x35   :  { %s59_s17 = sshll.u32 %s1506_s16, 4  ;;  %p1450_p10 = scmp.ne.s32.totalorder %s1651_s5, %s1449_s21  ;;  %s60_s17 = int_to_ptr.vmem [resolvable:$true] %s59_s17 }
  0x36   :  { %p1453_p11 = scmp.lt.u32.totalorder %s1449_s21, %s1651_s5 }
  0x38   :  { %p1455_p12 = pnand %p1453_p11, %p1450_p10 }
  0x3a   :  { %1458 = shalt.err (!%p1455_p12)
}
  0x3b   :  { %s1459_s1 = scalar_lea.vmem %s60_s17, 1024  ;;  %p1464_p0 = scmp.lt.s32.totalorder %s60_s17, %s60_s17 }
  0x3c   :  { %p1460_p13 = scmp.ne.s32.totalorder %s60_s17, %s1459_s1  ;;  %p1465_p1 = scmp.lt.s32.totalorder %s1459_s1, %s1459_s1 }
  0x3e   :  { %p1466_p2 = por %p1465_p1, %p1464_p0 }
  0x40   :  { %p1467_p3 = pnand %p1466_p2, %p1460_p13 }
  0x42   :  { %1470 = shalt.err (!%p1467_p3)
}
  0x43   :  { %65 = dma.hbm_to_vmem [thread:$0]  %s1651_s5, 1024, %s60_s17, [#allocation10], %s1502_s11, %s1502_s11, %s1503_s12  }
  0x44   :  { %1493 = dma.done.wait [#allocation4], 512  }
  0x45   :  { %1494 = vsyncadd [#allocation4], 4294966784 }
  0x46   :  { %1495 = dma.done.wait [#allocation7], 9216  }
  0x47   :  { %1496 = vsyncadd [#allocation7], 4294958080 }
  0x48   :  { %1497 = dma.done.wait [#allocation10], 1024  }
  0x49   :  { %1498 = vsyncadd [#allocation10], 4294966272  ;;  %v1295_v0 = vld [vmem:[#allocation6 + $0x40] sm:$0xff]   ;;  %v1299_v4 = vld [vmem:[#allocation6 + $0x48] sm:$0xff]   ;;  %vm1508_vm0 = vmmov 0   ;;  %s1509_s28 = smov [#allocation11]  }
  0x4a   :  { %v1296_v1 = vld [vmem:[#allocation6 + $0xc0] sm:$0xff]   ;;  %1140 = vmatprep.subr.bf16.mxu0 %v1295_v0  ;;  %v1300_v5 = vld [vmem:[#allocation6 + $0xc8] sm:$0xff]   ;;  %v1303_v8 = vld [vmem:[#allocation6 + $0x50] sm:$0xff]   ;;  %s1038_s29 = sshll.u32 %s1509_s28, 4  ;;  %s1039_s29 = int_to_ptr.vmem [resolvable:$true] %s1038_s29 }
  0x4b   :  { %v1297_v2 = vld [vmem:[#allocation6] sm:$0xff]   ;;  %1162 = vmatprep.subr.bf16.mxu1 %v1296_v1  ;;  %v1301_v6 = vld [vmem:[#allocation6 + $0x8] sm:$0xff]   ;;  %v1304_v9 = vld [vmem:[#allocation6 + $0xd0] sm:$0xff]   ;;  %p1476_p5 = scmp.lt.s32.totalorder %s1039_s29, %s1039_s29 }
  0x4c   :  { %v1298_v3 = vld [vmem:[#allocation6 + $0x80] sm:$0xff]   ;;  %1141 = vmatpush3.bf16.msra.mxu0 %v1297_v2  ;;  %v1302_v7 = vld [vmem:[#allocation6 + $0x88] sm:$0xff]   ;;  %v1305_v10 = vld [vmem:[#allocation6 + $0x10] sm:$0xff]  }
  0x4d   :  { %1163 = vmatpush3.bf16.msra.mxu1 %v1298_v3  ;;  %1142 = vmatprep.subr.bf16.mxu0 %v1299_v4  ;;  %v1306_v11 = vld [vmem:[#allocation6 + $0x90] sm:$0xff]   ;;  %v1307_v12 = vld [vmem:[#allocation6 + $0x58] sm:$0xff]   ;;  %v1311_v16 = vld [vmem:[#allocation6 + $0x60] sm:$0xff]  }
  0x4e   :  { %1164 = vmatprep.subr.bf16.mxu1 %v1300_v5  ;;  %v1308_v13 = vld [vmem:[#allocation6 + $0xd8] sm:$0xff]   ;;  %v1312_v17 = vld [vmem:[#allocation6 + $0xe0] sm:$0xff]   ;;  %v1315_v20 = vld [vmem:[#allocation6 + $0x68] sm:$0xff]  }
  0x4f   :  { %v1309_v14 = vld [vmem:[#allocation6 + $0x18] sm:$0xff]   ;;  %v1313_v18 = vld [vmem:[#allocation6 + $0x20] sm:$0xff]   ;;  %v1316_v21 = vld [vmem:[#allocation6 + $0xe8] sm:$0xff]  }
  0x50   :  { %1143 = vmatpush3.bf16.msra.mxu0 %v1301_v6  ;;  %v1310_v15 = vld [vmem:[#allocation6 + $0x98] sm:$0xff]   ;;  %v1314_v19 = vld [vmem:[#allocation6 + $0xa0] sm:$0xff]   ;;  %v1317_v22 = vld [vmem:[#allocation6 + $0x28] sm:$0xff]  }
  0x51   :  { %1165 = vmatpush3.bf16.msra.mxu1 %v1302_v7  ;;  %1144 = vmatprep.subr.bf16.mxu0 %v1303_v8  ;;  %v1318_v23 = vld [vmem:[#allocation6 + $0xa8] sm:$0xff]   ;;  %v1319_v24 = vld [vmem:[#allocation6 + $0x70] sm:$0xff]   ;;  %v1323_v28 = vld [vmem:[#allocation6 + $0x78] sm:$0xff]  }
  0x52   :  { %1166 = vmatprep.subr.bf16.mxu1 %v1304_v9  ;;  %v1320_v25 = vld [vmem:[#allocation6 + $0xf0] sm:$0xff]   ;;  %v1324_v29 = vld [vmem:[#allocation6 + $0xf8] sm:$0xff]   ;;  %v87_v32 = vld [vmem:[#allocation3] sm:$0xff] }
  0x53   :  { %v1321_v26 = vld [vmem:[#allocation6 + $0x30] sm:$0xff]   ;;  %v1325_v30 = vld [vmem:[#allocation6 + $0x38] sm:$0xff]   ;;  %v88_v33 = vld [vmem:[#allocation3 + $0x8] sm:$0xff]  ;;  %v1049_v34 = vcombine.low %v87_v32, %v87_v32  ;;  %v1050_v35 = vcombine.high %v87_v32, %v87_v32 }
  0x54   :  { %1145 = vmatpush3.bf16.msra.mxu0 %v1305_v10  ;;  %v1322_v27 = vld [vmem:[#allocation6 + $0xb0] sm:$0xff]   ;;  %v1326_v31 = vld [vmem:[#allocation6 + $0xb8] sm:$0xff]   ;;  %v1051_v36 = vcombine.low %v88_v33, %v88_v33  ;;  %v1052_v37 = vcombine.high %v88_v33, %v88_v33  ;;  %v1331_v38 = vld [vmem:[#allocation6 + $0x140] sm:$0xff]  }
  0x55   :  { %1167 = vmatpush3.bf16.msra.mxu1 %v1306_v11  ;;  %1146 = vmatprep.subr.bf16.mxu0 %v1307_v12  ;;  %v1332_v39 = vld [vmem:[#allocation6 + $0x1c0] sm:$0xff]   ;;  %v1335_v42 = vld [vmem:[#allocation6 + $0x148] sm:$0xff]   ;;  %v1339_v46 = vld [vmem:[#allocation6 + $0x150] sm:$0xff]  }
  0x56   :  { %1168 = vmatprep.subr.bf16.mxu1 %v1308_v13  ;;  %663 = vmatprep.mubr.bf16.mxu0 %v1050_v35  ;;  %v1333_v40 = vld [vmem:[#allocation6 + $0x100] sm:$0xff]   ;;  %v1336_v43 = vld [vmem:[#allocation6 + $0x1c8] sm:$0xff]   ;;  %v1340_v47 = vld [vmem:[#allocation6 + $0x1d0] sm:$0xff]   ;;  %v1507_v13 = vmov 0.0  }
  0x57   :  { %703 = vmatprep.mubr.bf16.mxu1 %v1052_v37  ;;  %v1334_v41 = vld [vmem:[#allocation6 + $0x180] sm:$0xff]   ;;  %v1337_v44 = vld [vmem:[#allocation6 + $0x108] sm:$0xff]   ;;  %v1341_v48 = vld [vmem:[#allocation6 + $0x110] sm:$0xff]  }
  0x58   :  { %1147 = vmatpush3.bf16.msra.mxu0 %v1309_v14  ;;  %v1338_v45 = vld [vmem:[#allocation6 + $0x188] sm:$0xff]   ;;  %v1342_v49 = vld [vmem:[#allocation6 + $0x190] sm:$0xff]   ;;  %v1343_v50 = vld [vmem:[#allocation6 + $0x158] sm:$0xff]  }
  0x59   :  { %1169 = vmatpush3.bf16.msra.mxu1 %v1310_v15  ;;  %1148 = vmatprep.subr.bf16.mxu0 %v1311_v16  ;;  %v1344_v51 = vld [vmem:[#allocation6 + $0x1d8] sm:$0xff]   ;;  %v1347_v54 = vld [vmem:[#allocation6 + $0x160] sm:$0xff]   ;;  %v1351_v58 = vld [vmem:[#allocation6 + $0x168] sm:$0xff]  }
  0x5a   :  { %1170 = vmatprep.subr.bf16.mxu1 %v1312_v17  ;;  %v1345_v52 = vld [vmem:[#allocation6 + $0x118] sm:$0xff]   ;;  %v1348_v55 = vld [vmem:[#allocation6 + $0x1e0] sm:$0xff]   ;;  %v1352_v59 = vld [vmem:[#allocation6 + $0x1e8] sm:$0xff]  }
  0x5b   :  { %v1346_v53 = vld [vmem:[#allocation6 + $0x198] sm:$0xff]   ;;  %v1349_v56 = vld [vmem:[#allocation6 + $0x120] sm:$0xff]   ;;  %v1353_v60 = vld [vmem:[#allocation6 + $0x128] sm:$0xff]  }
  0x5c   :  { %1149 = vmatpush3.bf16.msra.mxu0 %v1313_v18  ;;  %v1350_v57 = vld [vmem:[#allocation6 + $0x1a0] sm:$0xff]   ;;  %v1354_v61 = vld [vmem:[#allocation6 + $0x1a8] sm:$0xff]   ;;  %v1355_v62 = vld [vmem:[#allocation6 + $0x170] sm:$0xff]  }
  0x5d   :  { %1171 = vmatpush3.bf16.msra.mxu1 %v1314_v19  ;;  %1150 = vmatprep.subr.bf16.mxu0 %v1315_v20  ;;  %v1356_v63 = vld [vmem:[#allocation6 + $0x1f0] sm:$0xff]   ;;  %v1359_v2 = vld [vmem:[#allocation6 + $0x178] sm:$0xff]   ;;  %v1367_v12 = vld [vmem:[#allocation8] sm:$0xff]  }
  0x5e   :  { %1172 = vmatprep.subr.bf16.mxu1 %v1316_v21  ;;  %v1357_v0 = vld [vmem:[#allocation6 + $0x130] sm:$0xff]   ;;  %v1360_v3 = vld [vmem:[#allocation6 + $0x1f8] sm:$0xff]   ;;  %v1368_v14 = vld [vmem:[#allocation8 + $0x8] sm:$0xff]  }
  0x5f   :  { %v1358_v1 = vld [vmem:[#allocation6 + $0x1b0] sm:$0xff]   ;;  %v1361_v4 = vld [vmem:[#allocation6 + $0x138] sm:$0xff]   ;;  %v1371_v17 = vld [vmem:[#allocation8 + $0x20] sm:$0xff]  }
  0x60   :  { %1151 = vmatpush3.bf16.msra.mxu0 %v1317_v22  ;;  %v1362_v5 = vld [vmem:[#allocation6 + $0x1b8] sm:$0xff]   ;;  %v89_v6 = vld [vmem:[#allocation3 + $0x10] sm:$0xff]  ;;  %v1372_v18 = vld [vmem:[#allocation8 + $0x28] sm:$0xff]  }
  0x61   :  { %1173 = vmatpush3.bf16.msra.mxu1 %v1318_v23  ;;  %1152 = vmatprep.subr.bf16.mxu0 %v1319_v24  ;;  %v1053_v7 = vcombine.low %v89_v6, %v89_v6  ;;  %v1054_v8 = vcombine.high %v89_v6, %v89_v6  ;;  %v90_v9 = vld [vmem:[#allocation3 + $0x18] sm:$0xff]  ;;  %v1369_v15 = vld [vmem:[#allocation8 + $0x10] sm:$0xff]   ;;  %v1375_v21 = vld [vmem:[#allocation9] sm:$0xff]  }
  0x62   :  { %1174 = vmatprep.subr.bf16.mxu1 %v1320_v25  ;;  %v1055_v10 = vcombine.low %v90_v9, %v90_v9  ;;  %v1056_v11 = vcombine.high %v90_v9, %v90_v9  ;;  %v1370_v16 = vld [vmem:[#allocation8 + $0x18] sm:$0xff]   ;;  %v1373_v19 = vld [vmem:[#allocation8 + $0x30] sm:$0xff]   ;;  %v1376_v22 = vld [vmem:[#allocation9 + $0x8] sm:$0xff]  }
  0x63   :  { %v1374_v20 = vld [vmem:[#allocation8 + $0x38] sm:$0xff]   ;;  %v1377_v23 = vld [vmem:[#allocation9 + $0x10] sm:$0xff]   ;;  %v1379_v25 = vld [vmem:[#allocation9 + $0x20] sm:$0xff]  }
  0x64   :  { %1153 = vmatpush3.bf16.msra.mxu0 %v1321_v26  ;;  %v1378_v24 = vld [vmem:[#allocation9 + $0x18] sm:$0xff]   ;;  %v1380_v26 = vld [vmem:[#allocation9 + $0x28] sm:$0xff]  }
  0x65   :  { %1175 = vmatpush3.bf16.msra.mxu1 %v1322_v27  ;;  %1154 = vmatprep.subr.bf16.mxu0 %v1323_v28 }
  0x66   :  { %1176 = vmatprep.subr.bf16.mxu1 %v1324_v29 }
  0x68   :  { %1155 = vmatpush3.bf16.msra.mxu0 %v1325_v30 }
  0x69   :  { %1177 = vmatpush3.bf16.msra.mxu1 %v1326_v31  ;;  %1184 = vmatprep.subr.bf16.mxu0 %v1331_v38 }
  0x6a   :  { %1206 = vmatprep.subr.bf16.mxu1 %v1332_v39 }
  0x6b   :  { %664 = vmatmul.mubr.bf16.vlgmr.msra.gmra.mrb[0].mxu0 %v1049_v34 }
  0x6c   :  { %704 = vmatmul.mubr.bf16.vlgmr.msra.gmra.mrb[0].mxu1 %v1051_v36  ;;  %1185 = vmatpush3.bf16.msra.mxu0 %v1333_v40 }
  0x6d   :  { %1207 = vmatpush3.bf16.msra.mxu1 %v1334_v41  ;;  %1186 = vmatprep.subr.bf16.mxu0 %v1335_v42 }
  0x6e   :  { %1208 = vmatprep.subr.bf16.mxu1 %v1336_v43  ;;  %743 = vmatprep.mubr.bf16.mxu0 %v1054_v8 }
  0x6f   :  { %783 = vmatprep.mubr.bf16.mxu1 %v1056_v11 }
  0x70   :  { %1187 = vmatpush3.bf16.msra.mxu0 %v1337_v44 }
  0x71   :  { %1209 = vmatpush3.bf16.msra.mxu1 %v1338_v45  ;;  %1188 = vmatprep.subr.bf16.mxu0 %v1339_v46 }
  0x72   :  { %1210 = vmatprep.subr.bf16.mxu1 %v1340_v47 }
  0x74   :  { %1189 = vmatpush3.bf16.msra.mxu0 %v1341_v48 }
  0x75   :  { %1211 = vmatpush3.bf16.msra.mxu1 %v1342_v49  ;;  %1190 = vmatprep.subr.bf16.mxu0 %v1343_v50  ;;  %v1121_v49 = vld [vmem:[%s1648_s2] ss:$0 sm:$0xff] }
  0x76   :  { %1212 = vmatprep.subr.bf16.mxu1 %v1344_v51 }
  0x78   :  { %1191 = vmatpush3.bf16.msra.mxu0 %v1345_v52 }
  0x79   :  { %1213 = vmatpush3.bf16.msra.mxu1 %v1346_v53  ;;  %1192 = vmatprep.subr.bf16.mxu0 %v1347_v54  ;;  %v1381_v54 = vld [vmem:[#allocation9 + $0x30] sm:$0xff]  }
  0x7a   :  { %1214 = vmatprep.subr.bf16.mxu1 %v1348_v55  ;;  %v1382_v55 = vld [vmem:[#allocation9 + $0x38] sm:$0xff]  }
  0x7c   :  { %1193 = vmatpush3.bf16.msra.mxu0 %v1349_v56  ;;  %v1122_v56 = vld [vmem:[%s1650_s4] ss:$0 sm:$0xff]  ;;  %s1471_s4 = scalar_lea.vmem %s1039_s29, 128 }
  0x7d   :  { %1215 = vmatpush3.bf16.msra.mxu1 %v1350_v57  ;;  %1194 = vmatprep.subr.bf16.mxu0 %v1351_v58  ;;  %p1472_p4 = scmp.ne.s32.totalorder %s1039_s29, %s1471_s4  ;;  %p1477_p6 = scmp.lt.s32.totalorder %s1471_s4, %s1471_s4 }
  0x7e   :  { %1216 = vmatprep.subr.bf16.mxu1 %v1352_v59 }
  0x7f   :  { %p1478_p7 = por %p1477_p6, %p1476_p5 }
  0x80   :  { %1195 = vmatpush3.bf16.msra.mxu0 %v1353_v60 }
  0x81   :  { %1217 = vmatpush3.bf16.msra.mxu1 %v1354_v61  ;;  %1196 = vmatprep.subr.bf16.mxu0 %v1355_v62  ;;  %p1479_p8 = pnand %p1478_p7, %p1472_p4 }
  0x82   :  { %1218 = vmatprep.subr.bf16.mxu1 %v1356_v63 }
  0x84   :  { %1197 = vmatpush3.bf16.msra.mxu0 %v1357_v0  ;;  %v1131_v0 = vld [vmem:[%s1652_s6] ss:$0 sm:$0xff] }
  0x85   :  { %1219 = vmatpush3.bf16.msra.mxu1 %v1358_v1  ;;  %1198 = vmatprep.subr.bf16.mxu0 %v1359_v2 }
  0x86   :  { %1220 = vmatprep.subr.bf16.mxu1 %v1360_v3 }
  0x88   :  { %1199 = vmatpush3.bf16.msra.mxu0 %v1361_v4 }
  0x89   :  { %1221 = vmatpush3.bf16.msra.mxu1 %v1362_v5  ;;  %1246 = vmatprep.subr.bf16.mxu0 %v1507_v13 }
  0x8a   :  { %1266 = vmatprep.subr.bf16.mxu1 %v1507_v13 }
  0x8b   :  { %744 = vmatmul.mubr.bf16.vlgmr.msra.gmra.mrb[4].mxu0 %v1053_v7 }
  0x8c   :  { %784 = vmatmul.mubr.bf16.vlgmr.msra.gmra.mrb[4].mxu1 %v1055_v10  ;;  %1247 = vmatpush3.bf16.msra.mxu0 %v1367_v12 }
  0x8d   :  { %1248 = vmatprep.subr.bf16.mxu0 %v1507_v13  ;;  %1262 = vmatprep.mubr.msk.bf16.mxu0 %vm1508_vm0, %v1507_v13 }
  0x8e   :  { %1282 = vmatprep.mubr.msk.bf16.mxu1 %vm1508_vm0, %v1507_v13  ;;  %1267 = vmatpush3.bf16.msra.mxu1 %v1375_v21 }
  0x8f   :  { %1268 = vmatprep.subr.bf16.mxu1 %v1507_v13 }
  0x90   :  { %1249 = vmatpush3.bf16.msra.mxu0 %v1368_v14 }
  0x91   :  { %1250 = vmatprep.subr.bf16.mxu0 %v1507_v13 }
  0x92   :  { %1269 = vmatpush3.bf16.msra.mxu1 %v1376_v22 }
  0x93   :  { %1270 = vmatprep.subr.bf16.mxu1 %v1507_v13 }
  0x94   :  { %1251 = vmatpush3.bf16.msra.mxu0 %v1369_v15 }
  0x95   :  { %1252 = vmatprep.subr.bf16.mxu0 %v1507_v13 }
  0x96   :  { %1271 = vmatpush3.bf16.msra.mxu1 %v1377_v23 }
  0x97   :  { %1272 = vmatprep.subr.bf16.mxu1 %v1507_v13 }
  0x98   :  { %1253 = vmatpush3.bf16.msra.mxu0 %v1370_v16 }
  0x99   :  { %1254 = vmatprep.subr.bf16.mxu0 %v1507_v13 }
  0x9a   :  { %1273 = vmatpush3.bf16.msra.mxu1 %v1378_v24 }
  0x9b   :  { %1274 = vmatprep.subr.bf16.mxu1 %v1507_v13 }
  0x9c   :  { %1255 = vmatpush3.bf16.msra.mxu0 %v1371_v17 }
  0x9d   :  { %1256 = vmatprep.subr.bf16.mxu0 %v1507_v13 }
  0x9e   :  { %1275 = vmatpush3.bf16.msra.mxu1 %v1379_v25 }
  0x9f   :  { %1276 = vmatprep.subr.bf16.mxu1 %v1507_v13 }
  0xa0   :  { %1257 = vmatpush3.bf16.msra.mxu0 %v1372_v18 }
  0xa1   :  { %1258 = vmatprep.subr.bf16.mxu0 %v1507_v13 }
  0xa2   :  { %1277 = vmatpush3.bf16.msra.mxu1 %v1380_v26 }
  0xa3   :  { %1278 = vmatprep.subr.bf16.mxu1 %v1507_v13 }
  0xa4   :  { %1259 = vmatpush3.bf16.msra.mxu0 %v1373_v19 }
  0xa5   :  { %1260 = vmatprep.subr.bf16.mxu0 %v1507_v13 }
  0xa6   :  { %1279 = vmatpush3.bf16.msra.mxu1 %v1381_v54 }
  0xa7   :  { %1280 = vmatprep.subr.bf16.mxu1 %v1507_v13 }
  0xa8   :  { %1261 = vmatpush3.bf16.msra.mxu0 %v1374_v20 }
  0xaa   :  { %1281 = vmatpush3.bf16.msra.mxu1 %v1382_v55 }
 0x13e   :  { %v1156_v27 = vpop.f32.mrb[0].mxu0 }
 0x13f   :  { %v1178_v28 = vpop.f32.mrb[0].mxu1  ;;  %v1157_v29 = vpop.f32.mrb[1].mxu0 }
 0x140   :  { %v1179_v30 = vpop.f32.mrb[1].mxu1  ;;  %v1158_v31 = vadd.f32 %v1157_v29, %v1156_v27  ;;  %v1159_v33 = vpop.f32.mrb[2].mxu0 }
 0x141   :  { %v1180_v32 = vadd.f32 %v1179_v30, %v1178_v28  ;;  %v1181_v34 = vpop.f32.mrb[2].mxu1  ;;  %v1160_v35 = vpop.f32.mrb[3].mxu0 }
 0x142   :  { %v1182_v36 = vpop.f32.mrb[3].mxu1 }
 0x143   :  { %v706_v37 = vadd.f32 %v1180_v32, %v1158_v31 }
 0x15e   :  { %v1200_v38 = vpop.f32.mrb[4].mxu0 }
 0x15f   :  { %v1222_v39 = vpop.f32.mrb[4].mxu1  ;;  %v1201_v40 = vpop.f32.mrb[5].mxu0 }
 0x160   :  { %v1223_v41 = vpop.f32.mrb[5].mxu1  ;;  %v1202_v42 = vadd.f32 %v1201_v40, %v1200_v38  ;;  %v1203_v44 = vpop.f32.mrb[6].mxu0 }
 0x161   :  { %v1224_v43 = vadd.f32 %v1223_v41, %v1222_v39  ;;  %v1225_v45 = vpop.f32.mrb[6].mxu1  ;;  %v1204_v46 = vpop.f32.mrb[7].mxu0 }
 0x162   :  { %v1226_v47 = vpop.f32.mrb[7].mxu1  ;;  %v746_v48 = vadd.f32 %v1202_v42, %v706_v37 }
 0x164   :  { %v786_v50 = vadd.f32 %v1224_v43, %v746_v48 }
 0x166   :  { %v804_v51 = vadd.f32 %v1121_v49, %v786_v50 }
 0x168   :  { %v805_v52 = vmax.f32 %v804_v51, 0.0 }
 0x16a   :  { %v806_v53 = vpack.c.bf16 %v805_v52, %v805_v52 }
 0x16c   :  { %1263 = vmatmul.mubr.bf16.vlgmr.msra.gmra.mrb[8].mxu0 %v806_v53 }
 0x23f   :  { %v912_v57 = vpop.f32.mrb[8].mxu0 }
 0x240   :  { %v913_v58 = vadd.f32 %v1122_v56, %v912_v57  ;;  %v1264_v59 = vpop.f32.mrb[9].mxu0 }
 0x241   :  { %v915_v60 = vpop.f32.mrb[10].mxu0 }
 0x242   :  { %v918_v61 = vmax.f32 %v913_v58, 0.0  ;;  %v1265_v62 = vpop.f32.mrb[11].mxu0 }
 0x244   :  { %v919_v63 = vpack.c.bf16 %v918_v61, %v918_v61 }
 0x246   :  { %1283 = vmatmul.mubr.bf16.vlgmr.msra.gmra.mrb[8].mxu1 %v919_v63 }
 0x319   :  { %v1025_v1 = vpop.f32.mrb[8].mxu1 }
 0x31a   :  { %v1026_v2 = vadd.f32 %v1131_v0, %v1025_v1  ;;  %v1284_v3 = vpop.f32.mrb[9].mxu1 }
 0x31b   :  { %v1028_v4 = vpop.f32.mrb[10].mxu1 }
 0x31c   :  { %1031 = vst [vmem:[#allocation11] sm:$0xff] %v1026_v2  ;;  %v1285_v5 = vpop.f32.mrb[11].mxu1 }
 0x31d   :  { %1482 = shalt.err (!%p1479_p8)
}
 0x31e   :  { %s1483_s6 = scalar_lea.hbm %s1653_s7, 128 }
 0x31f   :  { %p1484_p9 = scmp.ne.s32.totalorder %s1653_s7, %s1483_s6  ;;  %p1487_p10 = scmp.lt.u32.totalorder %s1483_s6, %s1653_s7 }
 0x321   :  { %p1489_p11 = pnand %p1487_p10, %p1484_p9 }
 0x323   :  { %1492 = shalt.err (!%p1489_p11)
}
 0x324   :  { %1041 = dma.vmem_to_hbm [thread:$0]  %s1039_s29, 128, %s1653_s7, [#allocation5]  }
 0x325   :  { %1499 = dma.done.wait [#allocation5], 128  }
 0x326   :  { %1500 = vsyncadd [#allocation5], 4294967168 }
 0x327   :  { %1045 = vsyncpa [#allocation4], 1 }
 0x328   :  { %1046 = vsyncpa [#allocation7], 1 }
 0x329   :  { %1047 = vsyncpa [#allocation10], 1 }
 0x32a   :  { %1048 = vsyncpa [#allocation5], 1 }

// kernel: tpu_custom_call.1
= control target key start
LH: loop header
LB: loop body
LE: loop exit
PB: predicated region body
PF: predicated region fallthrough
CT: control target
= control target key end

     0   :  { %12 = vsyncpa [#allocation4], 0  ;;  %s1646_s0 = inlined_call_operand.hbm [shape: bf16[8,1024], index: 0, kind: input, shape index: {}]   ;;  %s1647_s1 = inlined_call_operand.hbm [shape: bf16[1024,128], index: 1, kind: input, shape index: {}]   ;;  %s1648_s2 = inlined_call_operand.vmem [shape: f32[1,128], index: 2, kind: input, shape index: {}]   ;;  %s1649_s3 = inlined_call_operand.hbm [shape: bf16[128,128], index: 3, kind: input, shape index: {}]   ;;  %s1650_s4 = inlined_call_operand.vmem [shape: f32[1,128], index: 4, kind: input, shape index: {}]   ;;  %s1651_s5 = inlined_call_operand.hbm [shape: bf16[128,128], index: 5, kind: input, shape index: {}]   ;;  %s1652_s6 = inlined_call_operand.vmem [shape: f32[1,128], index: 6, kind: input, shape index: {}]   ;;  %s1653_s7 = inlined_call_operand.hbm [shape: f32[8,128], index: 7, kind: output, shape index: {}]  }
   0x1   :  { %13 = vsyncpa [#allocation7], 0 }
   0x2   :  { %14 = vsyncpa [#allocation10], 0 }
   0x3   :  { %15 = vsyncpa [#allocation5], 0  ;;  %s1501_s24 = smov [#allocation6]   ;;  %s1383_s28 = scalar_lea.hbm %s1647_s1, 8192 }
   0x4   :  { %s31_s25 = sshll.u32 %s1501_s24, 4  ;;  %p1384_p0 = scmp.ne.s32.totalorder %s1647_s1, %s1383_s28  ;;  %s32_s25 = int_to_ptr.vmem [resolvable:$true] %s31_s25 }
   0x5   :  { %p1387_p1 = scmp.lt.u32.totalorder %s1383_s28, %s1647_s1 }
   0x7   :  { %p1389_p2 = pnand %p1387_p1, %p1384_p0 }
   0x9   :  { %1392 = shalt.err (!%p1389_p2)
}
   0xa   :  { %s1393_s10 = scalar_lea.vmem %s32_s25, 8192  ;;  %p1398_p4 = scmp.lt.s32.totalorder %s32_s25, %s32_s25 }
   0xb   :  { %p1394_p3 = scmp.ne.s32.totalorder %s32_s25, %s1393_s10  ;;  %p1399_p5 = scmp.lt.s32.totalorder %s1393_s10, %s1393_s10 }
   0xd   :  { %p1400_p6 = por %p1399_p5, %p1398_p4 }
   0xf   :  { %p1401_p7 = pnand %p1400_p6, %p1394_p3 }
  0x11   :  { %1404 = shalt.err (!%p1401_p7)
}
  0x12   :  { %s1502_s11 = smov 64   ;;  %s1503_s12 = smov 4  }
  0x13   :  { %37 = dma.hbm_to_vmem [thread:$0]  %s1647_s1, 8192, %s32_s25, [#allocation7], %s1502_s11, %s1502_s11, %s1503_s12  }
  0x14   :  { %s1504_s15 = smov [#allocation3]   ;;  %s1505_s17 = smov [#allocation8]  }
  0x15   :  { %s22_s16 = sshll.u32 %s1504_s15, 4  ;;  %s45_s18 = sshll.u32 %s1505_s17, 4  ;;  %s23_s16 = int_to_ptr.vmem [resolvable:$true] %s22_s16  ;;  %s46_s18 = int_to_ptr.vmem [resolvable:$true] %s45_s18 }
  0x16   :  { %s1405_s21 = scalar_lea.hbm %s1646_s0, 512 }
  0x17   :  { %p1406_p8 = scmp.ne.s32.totalorder %s1646_s0, %s1405_s21  ;;  %p1409_p9 = scmp.lt.u32.totalorder %s1405_s21, %s1646_s0 }
  0x19   :  { %p1411_p10 = pnand %p1409_p9, %p1406_p8 }
  0x1b   :  { %1414 = shalt.err (!%p1411_p10)
}
  0x1c   :  { %s1415_s1 = scalar_lea.vmem %s23_s16, 512  ;;  %p1420_p12 = scmp.lt.s32.totalorder %s23_s16, %s23_s16 }
  0x1d   :  { %p1416_p11 = scmp.ne.s32.totalorder %s23_s16, %s1415_s1  ;;  %p1421_p13 = scmp.lt.s32.totalorder %s1415_s1, %s1415_s1 }
  0x1f   :  { %p1422_p0 = por %p1421_p13, %p1420_p12 }
  0x21   :  { %p1423_p1 = pnand %p1422_p0, %p1416_p11 }
  0x23   :  { %1426 = shalt.err (!%p1423_p1)
}
  0x24   :  { %25 = dma.hbm_to_vmem [thread:$0]  %s1646_s0, 512, %s23_s16, [#allocation4]  }
  0x25   :  { %s1427_s30 = scalar_lea.hbm %s1649_s3, 1024 }
  0x26   :  { %p1428_p2 = scmp.ne.s32.totalorder %s1649_s3, %s1427_s30  ;;  %p1431_p3 = scmp.lt.u32.totalorder %s1427_s30, %s1649_s3 }
  0x28   :  { %p1433_p4 = pnand %p1431_p3, %p1428_p2 }
  0x2a   :  { %1436 = shalt.err (!%p1433_p4)
}
  0x2b   :  { %s1437_s14 = scalar_lea.vmem %s46_s18, 1024  ;;  %p1442_p6 = scmp.lt.s32.totalorder %s46_s18, %s46_s18 }
  0x2c   :  { %p1438_p5 = scmp.ne.s32.totalorder %s46_s18, %s1437_s14  ;;  %p1443_p7 = scmp.lt.s32.totalorder %s1437_s14, %s1437_s14 }
  0x2e   :  { %p1444_p8 = por %p1443_p7, %p1442_p6 }
  0x30   :  { %p1445_p9 = pnand %p1444_p8, %p1438_p5 }
  0x32   :  { %1448 = shalt.err (!%p1445_p9)
}
  0x33   :  { %51 = dma.hbm_to_vmem [thread:$0]  %s1649_s3, 1024, %s46_s18, [#allocation7], %s1502_s11, %s1502_s11, %s1503_s12  }
  0x34   :  { %s1506_s16 = smov [#allocation9]   ;;  %s1449_s21 = scalar_lea.hbm %s1651_s5, 1024 }
  0x35   :  { %s59_s17 = sshll.u32 %s1506_s16, 4  ;;  %p1450_p10 = scmp.ne.s32.totalorder %s1651_s5, %s1449_s21  ;;  %s60_s17 = int_to_ptr.vmem [resolvable:$true] %s59_s17 }
  0x36   :  { %p1453_p11 = scmp.lt.u32.totalorder %s1449_s21, %s1651_s5 }
  0x38   :  { %p1455_p12 = pnand %p1453_p11, %p1450_p10 }
  0x3a   :  { %1458 = shalt.err (!%p1455_p12)
}
  0x3b   :  { %s1459_s1 = scalar_lea.vmem %s60_s17, 1024  ;;  %p1464_p0 = scmp.lt.s32.totalorder %s60_s17, %s60_s17 }
  0x3c   :  { %p1460_p13 = scmp.ne.s32.totalorder %s60_s17, %s1459_s1  ;;  %p1465_p1 = scmp.lt.s32.totalorder %s1459_s1, %s1459_s1 }
  0x3e   :  { %p1466_p2 = por %p1465_p1, %p1464_p0 }
  0x40   :  { %p1467_p3 = pnand %p1466_p2, %p1460_p13 }
  0x42   :  { %1470 = shalt.err (!%p1467_p3)
}
  0x43   :  { %65 = dma.hbm_to_vmem [thread:$0]  %s1651_s5, 1024, %s60_s17, [#allocation10], %s1502_s11, %s1502_s11, %s1503_s12  }
  0x44   :  { %1493 = dma.done.wait [#allocation4], 512  }
  0x45   :  { %1494 = vsyncadd [#allocation4], 4294966784 }
  0x46   :  { %1495 = dma.done.wait [#allocation7], 9216  }
  0x47   :  { %1496 = vsyncadd [#allocation7], 4294958080 }
  0x48   :  { %1497 = dma.done.wait [#allocation10], 1024  }
  0x49   :  { %1498 = vsyncadd [#allocation10], 4294966272  ;;  %v1295_v0 = vld [vmem:[#allocation6 + $0x40] sm:$0xff]   ;;  %v1299_v4 = vld [vmem:[#allocation6 + $0x48] sm:$0xff]   ;;  %vm1508_vm0 = vmmov 0   ;;  %s1509_s28 = smov [#allocation11]  }
  0x4a   :  { %v1296_v1 = vld [vmem:[#allocation6 + $0xc0] sm:$0xff]   ;;  %1140 = vmatprep.subr.bf16.mxu0 %v1295_v0  ;;  %v1300_v5 = vld [vmem:[#allocation6 + $0xc8] sm:$0xff]   ;;  %v1303_v8 = vld [vmem:[#allocation6 + $0x50] sm:$0xff]   ;;  %s1038_s29 = sshll.u32 %s1509_s28, 4  ;;  %s1039_s29 = int_to_ptr.vmem [resolvable:$true] %s1038_s29 }
  0x4b   :  { %v1297_v2 = vld [vmem:[#allocation6] sm:$0xff]   ;;  %1162 = vmatprep.subr.bf16.mxu1 %v1296_v1  ;;  %v1301_v6 = vld [vmem:[#allocation6 + $0x8] sm:$0xff]   ;;  %v1304_v9 = vld [vmem:[#allocation6 + $0xd0] sm:$0xff]   ;;  %p1476_p5 = scmp.lt.s32.totalorder %s1039_s29, %s1039_s29 }
  0x4c   :  { %v1298_v3 = vld [vmem:[#allocation6 + $0x80] sm:$0xff]   ;;  %1141 = vmatpush3.bf16.msra.mxu0 %v1297_v2  ;;  %v1302_v7 = vld [vmem:[#allocation6 + $0x88] sm:$0xff]   ;;  %v1305_v10 = vld [vmem:[#allocation6 + $0x10] sm:$0xff]  }
  0x4d   :  { %1163 = vmatpush3.bf16.msra.mxu1 %v1298_v3  ;;  %1142 = vmatprep.subr.bf16.mxu0 %v1299_v4  ;;  %v1306_v11 = vld [vmem:[#allocation6 + $0x90] sm:$0xff]   ;;  %v1307_v12 = vld [vmem:[#allocation6 + $0x58] sm:$0xff]   ;;  %v1311_v16 = vld [vmem:[#allocation6 + $0x60] sm:$0xff]  }
  0x4e   :  { %1164 = vmatprep.subr.bf16.mxu1 %v1300_v5  ;;  %v1308_v13 = vld [vmem:[#allocation6 + $0xd8] sm:$0xff]   ;;  %v1312_v17 = vld [vmem:[#allocation6 + $0xe0] sm:$0xff]   ;;  %v1315_v20 = vld [vmem:[#allocation6 + $0x68] sm:$0xff]  }
  0x4f   :  { %v1309_v14 = vld [vmem:[#allocation6 + $0x18] sm:$0xff]   ;;  %v1313_v18 = vld [vmem:[#allocation6 + $0x20] sm:$0xff]   ;;  %v1316_v21 = vld [vmem:[#allocation6 + $0xe8] sm:$0xff]  }
  0x50   :  { %1143 = vmatpush3.bf16.msra.mxu0 %v1301_v6  ;;  %v1310_v15 = vld [vmem:[#allocation6 + $0x98] sm:$0xff]   ;;  %v1314_v19 = vld [vmem:[#allocation6 + $0xa0] sm:$0xff]   ;;  %v1317_v22 = vld [vmem:[#allocation6 + $0x28] sm:$0xff]  }
  0x51   :  { %1165 = vmatpush3.bf16.msra.mxu1 %v1302_v7  ;;  %1144 = vmatprep.subr.bf16.mxu0 %v1303_v8  ;;  %v1318_v23 = vld [vmem:[#allocation6 + $0xa8] sm:$0xff]   ;;  %v1319_v24 = vld [vmem:[#allocation6 + $0x70] sm:$0xff]   ;;  %v1323_v28 = vld [vmem:[#allocation6 + $0x78] sm:$0xff]  }
  0x52   :  { %1166 = vmatprep.subr.bf16.mxu1 %v1304_v9  ;;  %v1320_v25 = vld [vmem:[#allocation6 + $0xf0] sm:$0xff]   ;;  %v1324_v29 = vld [vmem:[#allocation6 + $0xf8] sm:$0xff]   ;;  %v87_v32 = vld [vmem:[#allocation3] sm:$0xff] }
  0x53   :  { %v1321_v26 = vld [vmem:[#allocation6 + $0x30] sm:$0xff]   ;;  %v1325_v30 = vld [vmem:[#allocation6 + $0x38] sm:$0xff]   ;;  %v88_v33 = vld [vmem:[#allocation3 + $0x8] sm:$0xff]  ;;  %v1049_v34 = vcombine.low %v87_v32, %v87_v32  ;;  %v1050_v35 = vcombine.high %v87_v32, %v87_v32 }
  0x54   :  { %1145 = vmatpush3.bf16.msra.mxu0 %v1305_v10  ;;  %v1322_v27 = vld [vmem:[#allocation6 + $0xb0] sm:$0xff]   ;;  %v1326_v31 = vld [vmem:[#allocation6 + $0xb8] sm:$0xff]   ;;  %v1051_v36 = vcombine.low %v88_v33, %v88_v33  ;;  %v1052_v37 = vcombine.high %v88_v33, %v88_v33  ;;  %v1331_v38 = vld [vmem:[#allocation6 + $0x140] sm:$0xff]  }
  0x55   :  { %1167 = vmatpush3.bf16.msra.mxu1 %v1306_v11  ;;  %1146 = vmatprep.subr.bf16.mxu0 %v1307_v12  ;;  %v1332_v39 = vld [vmem:[#allocation6 + $0x1c0] sm:$0xff]   ;;  %v1335_v42 = vld [vmem:[#allocation6 + $0x148] sm:$0xff]   ;;  %v1339_v46 = vld [vmem:[#allocation6 + $0x150] sm:$0xff]  }
  0x56   :  { %1168 = vmatprep.subr.bf16.mxu1 %v1308_v13  ;;  %663 = vmatprep.mubr.bf16.mxu0 %v1050_v35  ;;  %v1333_v40 = vld [vmem:[#allocation6 + $0x100] sm:$0xff]   ;;  %v1336_v43 = vld [vmem:[#allocation6 + $0x1c8] sm:$0xff]   ;;  %v1340_v47 = vld [vmem:[#allocation6 + $0x1d0] sm:$0xff]   ;;  %v1507_v13 = vmov 0.0  }
  0x57   :  { %703 = vmatprep.mubr.bf16.mxu1 %v1052_v37  ;;  %v1334_v41 = vld [vmem:[#allocation6 + $0x180] sm:$0xff]   ;;  %v1337_v44 = vld [vmem:[#allocation6 + $0x108] sm:$0xff]   ;;  %v1341_v48 = vld [vmem:[#allocation6 + $0x110] sm:$0xff]  }
  0x58   :  { %1147 = vmatpush3.bf16.msra.mxu0 %v1309_v14  ;;  %v1338_v45 = vld [vmem:[#allocation6 + $0x188] sm:$0xff]   ;;  %v1342_v49 = vld [vmem:[#allocation6 + $0x190] sm:$0xff]   ;;  %v1343_v50 = vld [vmem:[#allocation6 + $0x158] sm:$0xff]  }
  0x59   :  { %1169 = vmatpush3.bf16.msra.mxu1 %v1310_v15  ;;  %1148 = vmatprep.subr.bf16.mxu0 %v1311_v16  ;;  %v1344_v51 = vld [vmem:[#allocation6 + $0x1d8] sm:$0xff]   ;;  %v1347_v54 = vld [vmem:[#allocation6 + $0x160] sm:$0xff]   ;;  %v1351_v58 = vld [vmem:[#allocation6 + $0x168] sm:$0xff]  }
  0x5a   :  { %1170 = vmatprep.subr.bf16.mxu1 %v1312_v17  ;;  %v1345_v52 = vld [vmem:[#allocation6 + $0x118] sm:$0xff]   ;;  %v1348_v55 = vld [vmem:[#allocation6 + $0x1e0] sm:$0xff]   ;;  %v1352_v59 = vld [vmem:[#allocation6 + $0x1e8] sm:$0xff]  }
  0x5b   :  { %v1346_v53 = vld [vmem:[#allocation6 + $0x198] sm:$0xff]   ;;  %v1349_v56 = vld [vmem:[#allocation6 + $0x120] sm:$0xff]   ;;  %v1353_v60 = vld [vmem:[#allocation6 + $0x128] sm:$0xff]  }
  0x5c   :  { %1149 = vmatpush3.bf16.msra.mxu0 %v1313_v18  ;;  %v1350_v57 = vld [vmem:[#allocation6 + $0x1a0] sm:$0xff]   ;;  %v1354_v61 = vld [vmem:[#allocation6 + $0x1a8] sm:$0xff]   ;;  %v1355_v62 = vld [vmem:[#allocation6 + $0x170] sm:$0xff]  }
  0x5d   :  { %1171 = vmatpush3.bf16.msra.mxu1 %v1314_v19  ;;  %1150 = vmatprep.subr.bf16.mxu0 %v1315_v20  ;;  %v1356_v63 = vld [vmem:[#allocation6 + $0x1f0] sm:$0xff]   ;;  %v1359_v2 = vld [vmem:[#allocation6 + $0x178] sm:$0xff]   ;;  %v1367_v12 = vld [vmem:[#allocation8] sm:$0xff]  }
  0x5e   :  { %1172 = vmatprep.subr.bf16.mxu1 %v1316_v21  ;;  %v1357_v0 = vld [vmem:[#allocation6 + $0x130] sm:$0xff]   ;;  %v1360_v3 = vld [vmem:[#allocation6 + $0x1f8] sm:$0xff]   ;;  %v1368_v14 = vld [vmem:[#allocation8 + $0x8] sm:$0xff]  }
  0x5f   :  { %v1358_v1 = vld [vmem:[#allocation6 + $0x1b0] sm:$0xff]   ;;  %v1361_v4 = vld [vmem:[#allocation6 + $0x138] sm:$0xff]   ;;  %v1371_v17 = vld [vmem:[#allocation8 + $0x20] sm:$0xff]  }
  0x60   :  { %1151 = vmatpush3.bf16.msra.mxu0 %v1317_v22  ;;  %v1362_v5 = vld [vmem:[#allocation6 + $0x1b8] sm:$0xff]   ;;  %v89_v6 = vld [vmem:[#allocation3 + $0x10] sm:$0xff]  ;;  %v1372_v18 = vld [vmem:[#allocation8 + $0x28] sm:$0xff]  }
  0x61   :  { %1173 = vmatpush3.bf16.msra.mxu1 %v1318_v23  ;;  %1152 = vmatprep.subr.bf16.mxu0 %v1319_v24  ;;  %v1053_v7 = vcombine.low %v89_v6, %v89_v6  ;;  %v1054_v8 = vcombine.high %v89_v6, %v89_v6  ;;  %v90_v9 = vld [vmem:[#allocation3 + $0x18] sm:$0xff]  ;;  %v1369_v15 = vld [vmem:[#allocation8 + $0x10] sm:$0xff]   ;;  %v1375_v21 = vld [vmem:[#allocation9] sm:$0xff]  }
  0x62   :  { %1174 = vmatprep.subr.bf16.mxu1 %v1320_v25  ;;  %v1055_v10 = vcombine.low %v90_v9, %v90_v9  ;;  %v1056_v11 = vcombine.high %v90_v9, %v90_v9  ;;  %v1370_v16 = vld [vmem:[#allocation8 + $0x18] sm:$0xff]   ;;  %v1373_v19 = vld [vmem:[#allocation8 + $0x30] sm:$0xff]   ;;  %v1376_v22 = vld [vmem:[#allocation9 + $0x8] sm:$0xff]  }
  0x63   :  { %v1374_v20 = vld [vmem:[#allocation8 + $0x38] sm:$0xff]   ;;  %v1377_v23 = vld [vmem:[#allocation9 + $0x10] sm:$0xff]   ;;  %v1379_v25 = vld [vmem:[#allocation9 + $0x20] sm:$0xff]  }
  0x64   :  { %1153 = vmatpush3.bf16.msra.mxu0 %v1321_v26  ;;  %v1378_v24 = vld [vmem:[#allocation9 + $0x18] sm:$0xff]   ;;  %v1380_v26 = vld [vmem:[#allocation9 + $0x28] sm:$0xff]  }
  0x65   :  { %1175 = vmatpush3.bf16.msra.mxu1 %v1322_v27  ;;  %1154 = vmatprep.subr.bf16.mxu0 %v1323_v28 }
  0x66   :  { %1176 = vmatprep.subr.bf16.mxu1 %v1324_v29 }
  0x68   :  { %1155 = vmatpush3.bf16.msra.mxu0 %v1325_v30 }
  0x69   :  { %1177 = vmatpush3.bf16.msra.mxu1 %v1326_v31  ;;  %1184 = vmatprep.subr.bf16.mxu0 %v1331_v38 }
  0x6a   :  { %1206 = vmatprep.subr.bf16.mxu1 %v1332_v39 }
  0x6b   :  { %664 = vmatmul.mubr.bf16.vlgmr.msra.gmra.mrb[0].mxu0 %v1049_v34 }
  0x6c   :  { %704 = vmatmul.mubr.bf16.vlgmr.msra.gmra.mrb[0].mxu1 %v1051_v36  ;;  %1185 = vmatpush3.bf16.msra.mxu0 %v1333_v40 }
  0x6d   :  { %1207 = vmatpush3.bf16.msra.mxu1 %v1334_v41  ;;  %1186 = vmatprep.subr.bf16.mxu0 %v1335_v42 }
  0x6e   :  { %1208 = vmatprep.subr.bf16.mxu1 %v1336_v43  ;;  %743 = vmatprep.mubr.bf16.mxu0 %v1054_v8 }
  0x6f   :  { %783 = vmatprep.mubr.bf16.mxu1 %v1056_v11 }
  0x70   :  { %1187 = vmatpush3.bf16.msra.mxu0 %v1337_v44 }
  0x71   :  { %1209 = vmatpush3.bf16.msra.mxu1 %v1338_v45  ;;  %1188 = vmatprep.subr.bf16.mxu0 %v1339_v46 }
  0x72   :  { %1210 = vmatprep.subr.bf16.mxu1 %v1340_v47 }
  0x74   :  { %1189 = vmatpush3.bf16.msra.mxu0 %v1341_v48 }
  0x75   :  { %1211 = vmatpush3.bf16.msra.mxu1 %v1342_v49  ;;  %1190 = vmatprep.subr.bf16.mxu0 %v1343_v50  ;;  %v1121_v49 = vld [vmem:[%s1648_s2] ss:$0 sm:$0xff] }
  0x76   :  { %1212 = vmatprep.subr.bf16.mxu1 %v1344_v51 }
  0x78   :  { %1191 = vmatpush3.bf16.msra.mxu0 %v1345_v52 }
  0x79   :  { %1213 = vmatpush3.bf16.msra.mxu1 %v1346_v53  ;;  %1192 = vmatprep.subr.bf16.mxu0 %v1347_v54  ;;  %v1381_v54 = vld [vmem:[#allocation9 + $0x30] sm:$0xff]  }
  0x7a   :  { %1214 = vmatprep.subr.bf16.mxu1 %v1348_v55  ;;  %v1382_v55 = vld [vmem:[#allocation9 + $0x38] sm:$0xff]  }
  0x7c   :  { %1193 = vmatpush3.bf16.msra.mxu0 %v1349_v56  ;;  %v1122_v56 = vld [vmem:[%s1650_s4] ss:$0 sm:$0xff]  ;;  %s1471_s4 = scalar_lea.vmem %s1039_s29, 128 }
  0x7d   :  { %1215 = vmatpush3.bf16.msra.mxu1 %v1350_v57  ;;  %1194 = vmatprep.subr.bf16.mxu0 %v1351_v58  ;;  %p1472_p4 = scmp.ne.s32.totalorder %s1039_s29, %s1471_s4  ;;  %p1477_p6 = scmp.lt.s32.totalorder %s1471_s4, %s1471_s4 }
  0x7e   :  { %1216 = vmatprep.subr.bf16.mxu1 %v1352_v59 }
  0x7f   :  { %p1478_p7 = por %p1477_p6, %p1476_p5 }
  0x80   :  { %1195 = vmatpush3.bf16.msra.mxu0 %v1353_v60 }
  0x81   :  { %1217 = vmatpush3.bf16.msra.mxu1 %v1354_v61  ;;  %1196 = vmatprep.subr.bf16.mxu0 %v1355_v62  ;;  %p1479_p8 = pnand %p1478_p7, %p1472_p4 }
  0x82   :  { %1218 = vmatprep.subr.bf16.mxu1 %v1356_v63 }
  0x84   :  { %1197 = vmatpush3.bf16.msra.mxu0 %v1357_v0  ;;  %v1131_v0 = vld [vmem:[%s1652_s6] ss:$0 sm:$0xff] }
  0x85   :  { %1219 = vmatpush3.bf16.msra.mxu1 %v1358_v1  ;;  %1198 = vmatprep.subr.bf16.mxu0 %v1359_v2 }
  0x86   :  { %1220 = vmatprep.subr.bf16.mxu1 %v1360_v3 }
  0x88   :  { %1199 = vmatpush3.bf16.msra.mxu0 %v1361_v4 }
  0x89   :  { %1221 = vmatpush3.bf16.msra.mxu1 %v1362_v5  ;;  %1246 = vmatprep.subr.bf16.mxu0 %v1507_v13 }
  0x8a   :  { %1266 = vmatprep.subr.bf16.mxu1 %v1507_v13 }
  0x8b   :  { %744 = vmatmul.mubr.bf16.vlgmr.msra.gmra.mrb[4].mxu0 %v1053_v7 }
  0x8c   :  { %784 = vmatmul.mubr.bf16.vlgmr.msra.gmra.mrb[4].mxu1 %v1055_v10  ;;  %1247 = vmatpush3.bf16.msra.mxu0 %v1367_v12 }
  0x8d   :  { %1248 = vmatprep.subr.bf16.mxu0 %v1507_v13  ;;  %1262 = vmatprep.mubr.msk.bf16.mxu0 %vm1508_vm0, %v1507_v13 }
  0x8e   :  { %1282 = vmatprep.mubr.msk.bf16.mxu1 %vm1508_vm0, %v1507_v13  ;;  %1267 = vmatpush3.bf16.msra.mxu1 %v1375_v21 }
  0x8f   :  { %1268 = vmatprep.subr.bf16.mxu1 %v1507_v13 }
  0x90   :  { %1249 = vmatpush3.bf16.msra.mxu0 %v1368_v14 }
  0x91   :  { %1250 = vmatprep.subr.bf16.mxu0 %v1507_v13 }
  0x92   :  { %1269 = vmatpush3.bf16.msra.mxu1 %v1376_v22 }
  0x93   :  { %1270 = vmatprep.subr.bf16.mxu1 %v1507_v13 }
  0x94   :  { %1251 = vmatpush3.bf16.msra.mxu0 %v1369_v15 }
  0x95   :  { %1252 = vmatprep.subr.bf16.mxu0 %v1507_v13 }
  0x96   :  { %1271 = vmatpush3.bf16.msra.mxu1 %v1377_v23 }
  0x97   :  { %1272 = vmatprep.subr.bf16.mxu1 %v1507_v13 }
  0x98   :  { %1253 = vmatpush3.bf16.msra.mxu0 %v1370_v16 }
  0x99   :  { %1254 = vmatprep.subr.bf16.mxu0 %v1507_v13 }
  0x9a   :  { %1273 = vmatpush3.bf16.msra.mxu1 %v1378_v24 }
  0x9b   :  { %1274 = vmatprep.subr.bf16.mxu1 %v1507_v13 }
  0x9c   :  { %1255 = vmatpush3.bf16.msra.mxu0 %v1371_v17 }
  0x9d   :  { %1256 = vmatprep.subr.bf16.mxu0 %v1507_v13 }
  0x9e   :  { %1275 = vmatpush3.bf16.msra.mxu1 %v1379_v25 }
  0x9f   :  { %1276 = vmatprep.subr.bf16.mxu1 %v1507_v13 }
  0xa0   :  { %1257 = vmatpush3.bf16.msra.mxu0 %v1372_v18 }
  0xa1   :  { %1258 = vmatprep.subr.bf16.mxu0 %v1507_v13 }
  0xa2   :  { %1277 = vmatpush3.bf16.msra.mxu1 %v1380_v26 }
  0xa3   :  { %1278 = vmatprep.subr.bf16.mxu1 %v1507_v13 }
  0xa4   :  { %1259 = vmatpush3.bf16.msra.mxu0 %v1373_v19 }
  0xa5   :  { %1260 = vmatprep.subr.bf16.mxu0 %v1507_v13 }
  0xa6   :  { %1279 = vmatpush3.bf16.msra.mxu1 %v1381_v54 }
  0xa7   :  { %1280 = vmatprep.subr.bf16.mxu1 %v1507_v13 }
  0xa8   :  { %1261 = vmatpush3.bf16.msra.mxu0 %v1374_v20 }
  0xaa   :  { %1281 = vmatpush3.bf16.msra.mxu1 %v1382_v55 }
 0x13e   :  { %v1156_v27 = vpop.f32.mrb[0].mxu0 }
 0x13f   :  { %v1178_v28 = vpop.f32.mrb[0].mxu1  ;;  %v1157_v29 = vpop.f32.mrb[1].mxu0 }
 0x140   :  { %v1179_v30 = vpop.f32.mrb[1].mxu1  ;;  %v1158_v31 = vadd.f32 %v1157_v29, %v1156_v27  ;;  %v1159_v33 = vpop.f32.mrb[2].mxu0 }
 0x141   :  { %v1180_v32 = vadd.f32 %v1179_v30, %v1178_v28  ;;  %v1181_v34 = vpop.f32.mrb[2].mxu1  ;;  %v1160_v35 = vpop.f32.mrb[3].mxu0 }
 0x142   :  { %v1182_v36 = vpop.f32.mrb[3].mxu1 }
 0x143   :  { %v706_v37 = vadd.f32 %v1180_v32, %v1158_v31 }
 0x15e   :  { %v1200_v38 = vpop.f32.mrb[4].mxu0 }
 0x15f   :  { %v1222_v39 = vpop.f32.mrb[4].mxu1  ;;  %v1201_v40 = vpop.f32.mrb[5].mxu0 }
 0x160   :  { %v1223_v41 = vpop.f32.mrb[5].mxu1  ;;  %v1202_v42 = vadd.f32 %v1201_v40, %v1200_v38  ;;  %v1203_v44 = vpop.f32.mrb[6].mxu0 }
 0x161   :  { %v1224_v43 = vadd.f32 %v1223_v41, %v1222_v39  ;;  %v1225_v45 = vpop.f32.mrb[6].mxu1  ;;  %v1204_v46 = vpop.f32.mrb[7].mxu0 }
 0x162   :  { %v1226_v47 = vpop.f32.mrb[7].mxu1  ;;  %v746_v48 = vadd.f32 %v1202_v42, %v706_v37 }
 0x164   :  { %v786_v50 = vadd.f32 %v1224_v43, %v746_v48 }
 0x166   :  { %v804_v51 = vadd.f32 %v1121_v49, %v786_v50 }
 0x168   :  { %v805_v52 = vmax.f32 %v804_v51, 0.0 }
 0x16a   :  { %v806_v53 = vpack.c.bf16 %v805_v52, %v805_v52 }
 0x16c   :  { %1263 = vmatmul.mubr.bf16.vlgmr.msra.gmra.mrb[8].mxu0 %v806_v53 }
 0x23f   :  { %v912_v57 = vpop.f32.mrb[8].mxu0 }
 0x240   :  { %v913_v58 = vadd.f32 %v1122_v56, %v912_v57  ;;  %v1264_v59 = vpop.f32.mrb[9].mxu0 }
 0x241   :  { %v915_v60 = vpop.f32.mrb[10].mxu0 }
 0x242   :  { %v918_v61 = vmax.f32 %v913_v58, 0.0  ;;  %v1265_v62 = vpop.f32.mrb[11].mxu0 }
 0x244   :  { %v919_v63 = vpack.c.bf16 %v918_v61, %v918_v61 }
 0x246   :  { %1283 = vmatmul.mubr.bf16.vlgmr.msra.gmra.mrb[8].mxu1 %v919_v63 }
 0x319   :  { %v1025_v1 = vpop.f32.mrb[8].mxu1 }
 0x31a   :  { %v1026_v2 = vadd.f32 %v1131_v0, %v1025_v1  ;;  %v1284_v3 = vpop.f32.mrb[9].mxu1 }
 0x31b   :  { %v1028_v4 = vpop.f32.mrb[10].mxu1 }
 0x31c   :  { %1031 = vst [vmem:[#allocation11] sm:$0xff] %v1026_v2  ;;  %v1285_v5 = vpop.f32.mrb[11].mxu1 }
 0x31d   :  { %1482 = shalt.err (!%p1479_p8)
}
 0x31e   :  { %s1483_s6 = scalar_lea.hbm %s1653_s7, 128 }
 0x31f   :  { %p1484_p9 = scmp.ne.s32.totalorder %s1653_s7, %s1483_s6  ;;  %p1487_p10 = scmp.lt.u32.totalorder %s1483_s6, %s1653_s7 }
 0x321   :  { %p1489_p11 = pnand %p1487_p10, %p1484_p9 }
 0x323   :  { %1492 = shalt.err (!%p1489_p11)
}
 0x324   :  { %1041 = dma.vmem_to_hbm [thread:$0]  %s1039_s29, 128, %s1653_s7, [#allocation5]  }
 0x325   :  { %1499 = dma.done.wait [#allocation5], 128  }
 0x326   :  { %1500 = vsyncadd [#allocation5], 4294967168 }
 0x327   :  { %1045 = vsyncpa [#allocation4], 1 }
 0x328   :  { %1046 = vsyncpa [#allocation7], 1 }
 0x329   :  { %1047 = vsyncpa [#allocation10], 1 }
 0x32a   :  { %1048 = vsyncpa [#allocation5], 1 }

</bundles_post_ra>
